<compile_context>
chip_gen: v6e
topology: v6e:2x2x1
jax: 0.10.0
libtpu: 0.0.40
codegen_flags: <defaults>
</compile_context>

<pallas_src>
import math
from functools import partial

import jax
import jax.numpy as jnp
from jax import lax
from jax.experimental import pallas as pl
from jax.experimental.pallas import tpu as pltpu


# ----------------------- hardware / capability probes ----------------------- #

_VMEM_CAP = None


def _vmem_capacity_bytes():
    global _VMEM_CAP
    if _VMEM_CAP is None:
        try:
            _VMEM_CAP = int(pltpu.get_tpu_info().vmem_capacity_bytes)
        except Exception:
            _VMEM_CAP = 64 * 1024 * 1024   # conservative (v7x per-TC VMEM)
    return _VMEM_CAP


_WEIGHT_PIPELINE_KW = None


def _weight_pipeline_kwargs():
    """Single-buffer constant-index weight/bias blocks when pipeline_mode=
    pl.Buffered(1) is supported by the installed Pallas (saves VMEM on v7x)."""
    global _WEIGHT_PIPELINE_KW
    if _WEIGHT_PIPELINE_KW is not None:
        return _WEIGHT_PIPELINE_KW
    kw = {}
    if hasattr(pl, "Buffered"):
        try:
            def _probe_kernel(x_ref, w_ref, o_ref):
                o_ref[...] = x_ref[...] + w_ref[...]

            probe = pl.pallas_call(
                _probe_kernel,
                out_shape=jax.ShapeDtypeStruct((8, 128), jnp.float32),
                grid=(1,),
                in_specs=[
                    pl.BlockSpec((8, 128), lambda i: (0, 0)),
                    pl.BlockSpec((8, 128), lambda i: (0, 0),
                                 pipeline_mode=pl.Buffered(1)),
                ],
                out_specs=pl.BlockSpec((8, 128), lambda i: (0, 0)),
            )
            sds = jax.ShapeDtypeStruct((8, 128), jnp.float32)
            jax.jit(probe).lower(sds, sds).compile()
            kw = {"pipeline_mode": pl.Buffered(1)}
        except Exception:
            kw = {}
    _WEIGHT_PIPELINE_KW = kw
    return kw


# ----------------------------- kernel -------------------------------------- #

def _layer_norm_f32(x, gamma, beta, eps=1e-5):
    mu = jnp.mean(x, axis=-1, keepdims=True)
    var = jnp.mean((x - mu) ** 2, axis=-1, keepdims=True)
    return (x - mu) * lax.rsqrt(var + eps) * gamma + beta


def transformer_layer_kernel(xq_ref, xf_ref,
                             wq_ref, wk_ref, wv_ref, wo_ref, bo_ref,
                             w1_ref, b1_ref, w2_ref, b2_ref,
                             g1_ref, be1_ref, g2_ref, be2_ref,
                             gf_ref, bef_ref,
                             o_ref,
                             k_scr, v_scr, ctx_scr,
                             *, nhead, apply_final_norm, approx_recip):
    bf16 = jnp.bfloat16
    x_q = xq_ref[...]                        # (TQ, D) residual rows, f32
    TQ, D = x_q.shape
    dk = D // nhead
    scale = 1.0 / math.sqrt(dk)

    g1 = g1_ref[...]
    be1 = be1_ref[...]

    # K/V for the whole sequence: computed ONCE per batch row (query tile 0),
    # cached in bf16 VMEM scratch; reused by the remaining query tiles.
    @pl.when(pl.program_id(1) == 0)
    def _():
        xn_f = _layer_norm_f32(xf_ref[...], g1, be1).astype(bf16)       # (T, D)
        k_scr[...] = jnp.dot(xn_f, wk_ref[...],
                             preferred_element_type=jnp.float32).astype(bf16)
        v_scr[...] = jnp.dot(xn_f, wv_ref[...],
                             preferred_element_type=jnp.float32).astype(bf16)

    # Queries for this tile; 1/sqrt(dk) folded in once, bf16 cast once.
    xn_q = _layer_norm_f32(x_q, g1, be1).astype(bf16)
    q = (jnp.dot(xn_q, wq_ref[...], preferred_element_type=jnp.float32)
         * scale).astype(bf16)                                          # (TQ, D)

    k = k_scr[...]                                                      # (T, D) bf16
    v = v_scr[...]                                                      # (T, D) bf16

    def inv(x):
        return pl.reciprocal(x, approx=True) if approx_recip else 1.0 / x

    # Per-head attention.  Each head's context is written into its slice of
    # the (TQ, D) bf16 staging buffer; the Wo projection is ONE K=D matmul.
    for h in range(nhead):                   # static loop, nhead is small
        lo = h * dk
        qh = q[:, lo:lo + dk]                # (TQ, dk) bf16
        kh = k[:, lo:lo + dk]                # (T,  dk) bf16
        vh = v[:, lo:lo + dk]                # (T,  dk) bf16

        # q @ k^T with the transpose folded into dot_general (no XLU vxpose).
        s = lax.dot_general(qh, kh, (((1,), (1,)), ((), ())),
                            preferred_element_type=jnp.float32)         # (TQ, T)
        s = s - jnp.max(s, axis=-1, keepdims=True)
        p = jnp.exp(s)
        # Deferred normalization: scale (TQ, dk) context, not (TQ, T) probs.
        r = inv(jnp.sum(p, axis=-1, keepdims=True))                     # (TQ, 1)
        oh = jnp.dot(p.astype(bf16), vh, preferred_element_type=jnp.float32)
        ctx_scr[:, lo:lo + dk] = (oh * r).astype(bf16)

    attn = jnp.dot(ctx_scr[...], wo_ref[...],
                   preferred_element_type=jnp.float32) + bo_ref[...]    # (TQ, D)

    x_q = x_q + attn                          # dropout == identity (eval)

    # --- FFN on norm2(x) ---
    xn2 = _layer_norm_f32(x_q, g2_ref[...], be2_ref[...]).astype(bf16)
    h1 = jnp.dot(xn2, w1_ref[...], preferred_element_type=jnp.float32) + b1_ref[...]
    h1 = jnp.maximum(h1, 0.0)
    h2 = jnp.dot(h1.astype(bf16), w2_ref[...],
                 preferred_element_type=jnp.float32) + b2_ref[...]

    y = x_q + h2

    # Fused final LayerNorm on the last layer (saves a full HBM round trip).
    if apply_final_norm:
        y = _layer_norm_f32(y, gf_ref[...], bef_ref[...])

    o_ref[...] = y


# ----------------------------- wrapper -------------------------------------- #

def _vmem_footprint_bytes(T, TQ, D, F, weight_bufs):
    io = 4 * (2 * 2 * TQ * D + 2 * T * D)                  # f32 x tile (in+out) + full-seq block
    w = weight_bufs * 2 * (4 * D * D + 2 * D * F)          # bf16 weights
    small = weight_bufs * 4 * (8 * D + F)                  # f32 biases / LN params
    scr = 2 * (2 * T * D + TQ * D)                         # bf16 K/V/context scratch
    interm = 4 * (4 * TQ * D + TQ * T + 2 * TQ * F + T * D)  # rough in-kernel temps
    return io + w + small + scr + interm


def _pick_tq(T, D, F, vmem_cap, weight_bufs):
    budget = vmem_cap - (8 << 20)
    fallback = T
    for cand in (512, 256, 128, 64, 32, 16, 8):
        if T % cand == 0:
            fallback = cand
            if _vmem_footprint_bytes(T, cand, D, F, weight_bufs) <= budget:
                return cand
    return fallback


def _as_bf16(w):
    return w if w.dtype == jnp.bfloat16 else w.astype(jnp.bfloat16)


def prepare_layer_params(p):
    """Pre-cast matmul weights to bf16 ONCE (outside the per-step forward)."""
    q = dict(p)
    for name in ("wq", "wk", "wv", "wo", "w1", "w2"):
        q[name] = q[name].astype(jnp.bfloat16)
    return q


def transformer_layer(x, p, nhead, *, final_gamma=None, final_beta=None,
                      approx_recip=True):
    B, T, D = x.shape
    assert D % nhead == 0, "d_model must be divisible by nhead"
    F = p["w1"].shape[1]

    wkw = _weight_pipeline_kwargs()
    weight_bufs = 1 if wkw else 2
    vmem_cap = _vmem_capacity_bytes()
    TQ = _pick_tq(T, D, F, vmem_cap, weight_bufs)
    NQ = T // TQ

    apply_final = final_gamma is not None
    if final_gamma is None:
        final_gamma = jnp.ones((1, D), jnp.float32)
        final_beta = jnp.zeros((1, D), jnp.float32)

    # Weights should arrive pre-cast to bf16 (prepare_layer_params); the cast
    # here is a no-op in that case.
    wq, wk, wv, wo = map(_as_bf16, (p["wq"], p["wk"], p["wv"], p["wo"]))
    w1, w2 = map(_as_bf16, (p["w1"], p["w2"]))

    footprint = _vmem_footprint_bytes(T, TQ, D, F, weight_bufs)
    vmem_limit = int(min(vmem_cap - (8 << 20),
                         max(32 << 20, footprint + (4 << 20))))

    def full(shape):
        # Constant-index blocks; single-buffered when supported.
        return pl.BlockSpec(shape, lambda b, t: (0,) * len(shape), **wkw)

    kernel = partial(transformer_layer_kernel, nhead=nhead,
                     apply_final_norm=apply_final, approx_recip=approx_recip)

    # NOTE: at realistic configs pad D / F to multiples of 128 to avoid masked
    # vst/vld on the (*, D) blocks.
    return pl.pallas_call(
        kernel,
        out_shape=jax.ShapeDtypeStruct((B, T, D), jnp.float32),
        grid=(B, NQ),
        in_specs=[
            pl.BlockSpec((None, TQ, D), lambda b, t: (b, t, 0)),  # query-row tile
            pl.BlockSpec((None, T, D), lambda b, t: (b, 0, 0)),   # full seq (K/V at t==0)
            full((D, D)), full((D, D)), full((D, D)),             # wq, wk, wv (bf16)
            full((D, D)), full((1, D)),                           # wo (bf16), bo
            full((D, F)), full((1, F)),                           # w1 (bf16), b1
            full((F, D)), full((1, D)),                           # w2 (bf16), b2
            full((1, D)), full((1, D)),                           # norm1 gamma/beta
            full((1, D)), full((1, D)),                           # norm2 gamma/beta
            full((1, D)), full((1, D)),                           # final gamma/beta
        ],
        out_specs=pl.BlockSpec((None, TQ, D), lambda b, t: (b, t, 0)),
        scratch_shapes=[
            pltpu.VMEM((T, D), jnp.bfloat16),    # cached K (per batch row)
            pltpu.VMEM((T, D), jnp.bfloat16),    # cached V
            pltpu.VMEM((TQ, D), jnp.bfloat16),   # per-head context staging
        ],
        compiler_params=pltpu.CompilerParams(
            # batch axis 'parallel' keeps both v7x TensorCores busy when B>=2;
            # query-tile axis must be 'arbitrary' so the cached K/V is valid.
            dimension_semantics=("parallel", "arbitrary"),
            vmem_limit_bytes=vmem_limit),
    )(x, x, wq, wk, wv, wo, p["bo"], w1, p["b1"], w2, p["b2"],
      p["g1"], p["be1"], p["g2"], p["be2"], final_gamma, final_beta)


def transformer_forward(x, layer_params, final_gamma, final_beta, nhead,
                        approx_recip=True):
    n = len(layer_params)
    for i, p in enumerate(layer_params):
        last = (i == n - 1)
        x = transformer_layer(
            x, p, nhead,
            final_gamma=final_gamma if last else None,
            final_beta=final_beta if last else None,
            approx_recip=approx_recip)
    return x


# ----------------------- pure-JAX reference (f32, spec semantics) ----------- #

def _ref_ln(x, g, b, eps=1e-5):
    mu = x.mean(-1, keepdims=True)
    var = ((x - mu) ** 2).mean(-1, keepdims=True)
    return (x - mu) / jnp.sqrt(var + eps) * g + b


def ref_forward(x, layer_params, final_gamma, final_beta, nhead):
    B, T, D = x.shape
    dk = D // nhead
    for p in layer_params:
        xn = _ref_ln(x, p["g1"], p["be1"])
        q = (xn @ p["wq"]).reshape(B, T, nhead, dk).transpose(0, 2, 1, 3)
        k = (xn @ p["wk"]).reshape(B, T, nhead, dk).transpose(0, 2, 1, 3)
        v = (xn @ p["wv"]).reshape(B, T, nhead, dk).transpose(0, 2, 1, 3)
        s = jnp.einsum("bhtd,bhsd->bhts", q, k) / math.sqrt(dk)
        a = jax.nn.softmax(s, axis=-1)
        o = jnp.einsum("bhts,bhsd->bhtd", a, v)
        o = o.transpose(0, 2, 1, 3).reshape(B, T, D)
        x = x + (o @ p["wo"] + p["bo"])
        xn2 = _ref_ln(x, p["g2"], p["be2"])
        h = jnp.maximum(xn2 @ p["w1"] + p["b1"], 0.0)
        x = x + (h @ p["w2"] + p["b2"])
    return _ref_ln(x, final_gamma, final_beta)


# -------------------------------- main -------------------------------------- #

def init_layer_params(key, D, F):
    ks = jax.random.split(key, 12)
    s = 0.1
    return dict(
        wq=jax.random.normal(ks[0], (D, D), jnp.float32) * s,
        wk=jax.random.normal(ks[1], (D, D), jnp.float32) * s,
        wv=jax.random.normal(ks[2], (D, D), jnp.float32) * s,
        wo=jax.random.normal(ks[3], (D, D), jnp.float32) * s,
        bo=jax.random.normal(ks[4], (1, D), jnp.float32) * s,
        w1=jax.random.normal(ks[5], (D, F), jnp.float32) * s,
        b1=jax.random.normal(ks[6], (1, F), jnp.float32) * s,
        w2=jax.random.normal(ks[7], (F, D), jnp.float32) * s,
        b2=jax.random.normal(ks[8], (1, D), jnp.float32) * s,
        g1=jnp.ones((1, D), jnp.float32) + jax.random.normal(ks[9], (1, D)) * 0.01,
        be1=jax.random.normal(ks[10], (1, D), jnp.float32) * 0.01,
        g2=jnp.ones((1, D), jnp.float32),
        be2=jax.random.normal(ks[11], (1, D), jnp.float32) * 0.01,
    )


if __name__ == "__main__":
    num_layers, d_model, nhead, dim_ff = 2, 32, 4, 64
    B, T = 2, 8

    key = jax.random.PRNGKey(0)
    key, xkey, gkey = jax.random.split(key, 3)
    layer_keys = jax.random.split(key, num_layers)

    raw_params = [init_layer_params(k, d_model, dim_ff) for k in layer_keys]
    layer_params = [prepare_layer_params(p) for p in raw_params]  # bf16 weights, once
    final_gamma = jnp.ones((1, d_model), jnp.float32)
    final_beta = jax.random.normal(gkey, (1, d_model), jnp.float32) * 0.01

    x = jax.random.normal(xkey, (B, T, d_model), jnp.float32)

    # Warm the capability / hardware probes outside the main jit trace.
    _weight_pipeline_kwargs()
    _vmem_capacity_bytes()

    fwd = jax.jit(lambda x_, lp_, g_, b_: transformer_forward(x_, lp_, g_, b_, nhead))
    out = jax.block_until_ready(fwd(x, layer_params, final_gamma, final_beta))

    ref = ref_forward(x, raw_params, final_gamma, final_beta, nhead)
    assert out.shape == (B, T, d_model)
    max_err = float(jnp.max(jnp.abs(out - ref)))
    # bf16 matmul inputs + approx reciprocal => small deviation from f32 reference.
    assert max_err < 5e-2, f"mismatch vs JAX reference: max abs err {max_err}"

    print("KERNEL_OK")
</pallas_src>

<mosaic_0001>
module attributes {stable_mosaic.version = 11 : i64} {
  func.func @transformer_layer_kernel(%arg0: i32, %arg1: i32, %arg2: memref<1x8x32xf32, #tpu.memory_space<vmem>>, %arg3: memref<1x8x32xf32, #tpu.memory_space<vmem>>, %arg4: memref<32x32xbf16, #tpu.memory_space<vmem>>, %arg5: memref<32x32xbf16, #tpu.memory_space<vmem>>, %arg6: memref<32x32xbf16, #tpu.memory_space<vmem>>, %arg7: memref<32x32xbf16, #tpu.memory_space<vmem>>, %arg8: memref<1x32xf32, #tpu.memory_space<vmem>>, %arg9: memref<32x64xbf16, #tpu.memory_space<vmem>>, %arg10: memref<1x64xf32, #tpu.memory_space<vmem>>, %arg11: memref<64x32xbf16, #tpu.memory_space<vmem>>, %arg12: memref<1x32xf32, #tpu.memory_space<vmem>>, %arg13: memref<1x32xf32, #tpu.memory_space<vmem>>, %arg14: memref<1x32xf32, #tpu.memory_space<vmem>>, %arg15: memref<1x32xf32, #tpu.memory_space<vmem>>, %arg16: memref<1x32xf32, #tpu.memory_space<vmem>>, %arg17: memref<1x32xf32, #tpu.memory_space<vmem>>, %arg18: memref<1x32xf32, #tpu.memory_space<vmem>>, %arg19: memref<1x8x32xf32, #tpu.memory_space<vmem>>, %arg20: memref<8x32xbf16, #tpu.memory_space<vmem>>, %arg21: memref<8x32xbf16, #tpu.memory_space<vmem>>, %arg22: memref<8x32xbf16, #tpu.memory_space<vmem>>) attributes {dimension_semantics = [#tpu.dimension_semantics<parallel>, #tpu.dimension_semantics<arbitrary>], iteration_bounds = array<i64: 2, 1>, scalar_prefetch = 0 : i64, scratch_operands = 3 : i64, tpu.core_type = #tpu.core_type<tc>, window_params = [{transform_indices = @transform_0, window_bounds = array<i64: 1, 8, 32>}, {transform_indices = @transform_1, window_bounds = array<i64: 1, 8, 32>}, {pipeline_mode = #tpu.pipeline_mode<synchronous>, transform_indices = @transform_2, window_bounds = array<i64: 32, 32>}, {pipeline_mode = #tpu.pipeline_mode<synchronous>, transform_indices = @transform_3, window_bounds = array<i64: 32, 32>}, {pipeline_mode = #tpu.pipeline_mode<synchronous>, transform_indices = @transform_4, window_bounds = array<i64: 32, 32>}, {pipeline_mode = #tpu.pipeline_mode<synchronous>, transform_indices = @transform_5, window_bounds = array<i64: 32, 32>}, {pipeline_mode = #tpu.pipeline_mode<synchronous>, transform_indices = @transform_6, window_bounds = array<i64: 1, 32>}, {pipeline_mode = #tpu.pipeline_mode<synchronous>, transform_indices = @transform_7, window_bounds = array<i64: 32, 64>}, {pipeline_mode = #tpu.pipeline_mode<synchronous>, transform_indices = @transform_8, window_bounds = array<i64: 1, 64>}, {pipeline_mode = #tpu.pipeline_mode<synchronous>, transform_indices = @transform_9, window_bounds = array<i64: 64, 32>}, {pipeline_mode = #tpu.pipeline_mode<synchronous>, transform_indices = @transform_10, window_bounds = array<i64: 1, 32>}, {pipeline_mode = #tpu.pipeline_mode<synchronous>, transform_indices = @transform_11, window_bounds = array<i64: 1, 32>}, {pipeline_mode = #tpu.pipeline_mode<synchronous>, transform_indices = @transform_12, window_bounds = array<i64: 1, 32>}, {pipeline_mode = #tpu.pipeline_mode<synchronous>, transform_indices = @transform_13, window_bounds = array<i64: 1, 32>}, {pipeline_mode = #tpu.pipeline_mode<synchronous>, transform_indices = @transform_14, window_bounds = array<i64: 1, 32>}, {pipeline_mode = #tpu.pipeline_mode<synchronous>, transform_indices = @transform_15, window_bounds = array<i64: 1, 32>}, {pipeline_mode = #tpu.pipeline_mode<synchronous>, transform_indices = @transform_16, window_bounds = array<i64: 1, 32>}, {transform_indices = @transform_17, window_bounds = array<i64: 1, 8, 32>}]} {
    %c0 = arith.constant 0 : index
    %c0_0 = arith.constant 0 : index
    %c0_1 = arith.constant 0 : index
    %0 = vector.load %arg2[%c0, %c0_0, %c0_1] : memref<1x8x32xf32, #tpu.memory_space<vmem>>, vector<1x8x32xf32>
    %1 = vector.shape_cast %0 : vector<1x8x32xf32> to vector<8x32xf32>
    %c0_2 = arith.constant 0 : index
    %c0_3 = arith.constant 0 : index
    %2 = vector.load %arg13[%c0_2, %c0_3] : memref<1x32xf32, #tpu.memory_space<vmem>>, vector<1x32xf32>
    %c0_4 = arith.constant 0 : index
    %c0_5 = arith.constant 0 : index
    %3 = vector.load %arg14[%c0_4, %c0_5] : memref<1x32xf32, #tpu.memory_space<vmem>>, vector<1x32xf32>
    %c0_i32 = arith.constant 0 : i32
    %4 = arith.cmpi eq, %arg1, %c0_i32 : i32
    %5 = arith.extui %4 : i1 to i32
    %c0_i32_6 = arith.constant 0 : i32
    %6 = arith.cmpi ne, %5, %c0_i32_6 : i32
    scf.if %6 {
      %c0_70 = arith.constant 0 : index
      %c0_71 = arith.constant 0 : index
      %c0_72 = arith.constant 0 : index
      %158 = vector.load %arg3[%c0_70, %c0_71, %c0_72] : memref<1x8x32xf32, #tpu.memory_space<vmem>>, vector<1x8x32xf32>
      %159 = vector.shape_cast %158 : vector<1x8x32xf32> to vector<8x32xf32>
      %cst_73 = arith.constant dense<0.000000e+00> : vector<8xf32>
      %160 = vector.multi_reduction <add>, %159, %cst_73 [1] : vector<8x32xf32> to vector<8xf32>
      %161 = vector.shape_cast %160 : vector<8xf32> to vector<8x1xf32>
      %cst_74 = arith.constant 3.200000e+01 : f32
      %162 = vector.broadcast %cst_74 : f32 to vector<8x1xf32>
      %163 = arith.divf %161, %162 : vector<8x1xf32>
      %164 = vector.broadcast %163 : vector<8x1xf32> to vector<8x32xf32>
      %165 = arith.subf %159, %164 : vector<8x32xf32>
      %166 = arith.mulf %165, %165 : vector<8x32xf32>
      %cst_75 = arith.constant dense<0.000000e+00> : vector<8xf32>
      %167 = vector.multi_reduction <add>, %166, %cst_75 [1] : vector<8x32xf32> to vector<8xf32>
      %168 = vector.shape_cast %167 : vector<8xf32> to vector<8x1xf32>
      %cst_76 = arith.constant 3.200000e+01 : f32
      %169 = vector.broadcast %cst_76 : f32 to vector<8x1xf32>
      %170 = arith.divf %168, %169 : vector<8x1xf32>
      %171 = vector.broadcast %163 : vector<8x1xf32> to vector<8x32xf32>
      %172 = arith.subf %159, %171 : vector<8x32xf32>
      %cst_77 = arith.constant 9.99999974E-6 : f32
      %173 = vector.broadcast %cst_77 : f32 to vector<8x1xf32>
      %174 = arith.addf %170, %173 : vector<8x1xf32>
      %175 = math.rsqrt %174 : vector<8x1xf32>
      %176 = vector.broadcast %175 : vector<8x1xf32> to vector<8x32xf32>
      %177 = arith.mulf %172, %176 : vector<8x32xf32>
      %178 = vector.broadcast %2 : vector<1x32xf32> to vector<8x32xf32>
      %179 = arith.mulf %177, %178 : vector<8x32xf32>
      %180 = vector.broadcast %3 : vector<1x32xf32> to vector<8x32xf32>
      %181 = arith.addf %179, %180 : vector<8x32xf32>
      %182 = arith.truncf %181 : vector<8x32xf32> to vector<8x32xbf16>
      %c0_78 = arith.constant 0 : index
      %c0_79 = arith.constant 0 : index
      %183 = vector.load %arg5[%c0_78, %c0_79] : memref<32x32xbf16, #tpu.memory_space<vmem>>, vector<32x32xbf16>
      %cst_80 = arith.constant dense<0.000000e+00> : vector<8x32xf32>
      %184 = tpu.matmul %182, %183, %cst_80 {dimension_numbers = #tpu.dot_dimension_numbers<[1], [0], [0], [1], [0, 0, 1, 1], [], []>} : vector<8x32xbf16>, vector<32x32xbf16>, vector<8x32xf32> -> vector<8x32xf32>
      %185 = arith.truncf %184 : vector<8x32xf32> to vector<8x32xbf16>
      %c0_81 = arith.constant 0 : index
      %c0_82 = arith.constant 0 : index
      %186 = vector.load %arg20[%c0_81, %c0_82] : memref<8x32xbf16, #tpu.memory_space<vmem>>, vector<8x32xbf16>
      tpu.vector_store %arg20[%c0_81, %c0_82], %185 {strides = array<i32>} : memref<8x32xbf16, #tpu.memory_space<vmem>>, vector<8x32xbf16>,
      %c0_83 = arith.constant 0 : index
      %c0_84 = arith.constant 0 : index
      %187 = vector.load %arg6[%c0_83, %c0_84] : memref<32x32xbf16, #tpu.memory_space<vmem>>, vector<32x32xbf16>
      %cst_85 = arith.constant dense<0.000000e+00> : vector<8x32xf32>
      %188 = tpu.matmul %182, %187, %cst_85 {dimension_numbers = #tpu.dot_dimension_numbers<[1], [0], [0], [1], [0, 0, 1, 1], [], []>} : vector<8x32xbf16>, vector<32x32xbf16>, vector<8x32xf32> -> vector<8x32xf32>
      %189 = arith.truncf %188 : vector<8x32xf32> to vector<8x32xbf16>
      %c0_86 = arith.constant 0 : index
      %c0_87 = arith.constant 0 : index
      %190 = vector.load %arg21[%c0_86, %c0_87] : memref<8x32xbf16, #tpu.memory_space<vmem>>, vector<8x32xbf16>
      tpu.vector_store %arg21[%c0_86, %c0_87], %189 {strides = array<i32>} : memref<8x32xbf16, #tpu.memory_space<vmem>>, vector<8x32xbf16>,
    } else {
    }
    %cst = arith.constant dense<0.000000e+00> : vector<8xf32>
    %7 = vector.multi_reduction <add>, %1, %cst [1] : vector<8x32xf32> to vector<8xf32>
    %8 = vector.shape_cast %7 : vector<8xf32> to vector<8x1xf32>
    %cst_7 = arith.constant 3.200000e+01 : f32
    %9 = vector.broadcast %cst_7 : f32 to vector<8x1xf32>
    %10 = arith.divf %8, %9 : vector<8x1xf32>
    %11 = vector.broadcast %10 : vector<8x1xf32> to vector<8x32xf32>
    %12 = arith.subf %1, %11 : vector<8x32xf32>
    %13 = arith.mulf %12, %12 : vector<8x32xf32>
    %cst_8 = arith.constant dense<0.000000e+00> : vector<8xf32>
    %14 = vector.multi_reduction <add>, %13, %cst_8 [1] : vector<8x32xf32> to vector<8xf32>
    %15 = vector.shape_cast %14 : vector<8xf32> to vector<8x1xf32>
    %cst_9 = arith.constant 3.200000e+01 : f32
    %16 = vector.broadcast %cst_9 : f32 to vector<8x1xf32>
    %17 = arith.divf %15, %16 : vector<8x1xf32>
    %18 = vector.broadcast %10 : vector<8x1xf32> to vector<8x32xf32>
    %19 = arith.subf %1, %18 : vector<8x32xf32>
    %cst_10 = arith.constant 9.99999974E-6 : f32
    %20 = vector.broadcast %cst_10 : f32 to vector<8x1xf32>
    %21 = arith.addf %17, %20 : vector<8x1xf32>
    %22 = math.rsqrt %21 : vector<8x1xf32>
    %23 = vector.broadcast %22 : vector<8x1xf32> to vector<8x32xf32>
    %24 = arith.mulf %19, %23 : vector<8x32xf32>
    %25 = vector.broadcast %2 : vector<1x32xf32> to vector<8x32xf32>
    %26 = arith.mulf %24, %25 : vector<8x32xf32>
    %27 = vector.broadcast %3 : vector<1x32xf32> to vector<8x32xf32>
    %28 = arith.addf %26, %27 : vector<8x32xf32>
    %29 = arith.truncf %28 : vector<8x32xf32> to vector<8x32xbf16>
    %c0_11 = arith.constant 0 : index
    %c0_12 = arith.constant 0 : index
    %30 = vector.load %arg4[%c0_11, %c0_12] : memref<32x32xbf16, #tpu.memory_space<vmem>>, vector<32x32xbf16>
    %cst_13 = arith.constant dense<0.000000e+00> : vector<8x32xf32>
    %31 = tpu.matmul %29, %30, %cst_13 {dimension_numbers = #tpu.dot_dimension_numbers<[1], [0], [0], [1], [0, 0, 1, 1], [], []>} : vector<8x32xbf16>, vector<32x32xbf16>, vector<8x32xf32> -> vector<8x32xf32>
    %cst_14 = arith.constant 0.353553385 : f32
    %32 = vector.broadcast %cst_14 : f32 to vector<8x32xf32>
    %33 = arith.mulf %31, %32 : vector<8x32xf32>
    %34 = arith.truncf %33 : vector<8x32xf32> to vector<8x32xbf16>
    %c0_15 = arith.constant 0 : index
    %c0_16 = arith.constant 0 : index
    %35 = vector.load %arg20[%c0_15, %c0_16] : memref<8x32xbf16, #tpu.memory_space<vmem>>, vector<8x32xbf16>
    %c0_17 = arith.constant 0 : index
    %c0_18 = arith.constant 0 : index
    %36 = vector.load %arg21[%c0_17, %c0_18] : memref<8x32xbf16, #tpu.memory_space<vmem>>, vector<8x32xbf16>
    %37 = vector.extract_strided_slice %34 {offsets = [0, 0], sizes = [8, 8], strides = [1, 1]} : vector<8x32xbf16> to vector<8x8xbf16>
    %38 = vector.extract_strided_slice %35 {offsets = [0, 0], sizes = [8, 8], strides = [1, 1]} : vector<8x32xbf16> to vector<8x8xbf16>
    %39 = vector.extract_strided_slice %36 {offsets = [0, 0], sizes = [8, 8], strides = [1, 1]} : vector<8x32xbf16> to vector<8x8xbf16>
    %cst_19 = arith.constant dense<0.000000e+00> : vector<8x8xf32>
    %40 = tpu.matmul %37, %38, %cst_19 {dimension_numbers = #tpu.dot_dimension_numbers<[1], [1], [0], [0], [0, 0, 1, 0], [], []>} : vector<8x8xbf16>, vector<8x8xbf16>, vector<8x8xf32> -> vector<8x8xf32>
    %cst_20 = arith.constant dense<0xFF800000> : vector<8xf32>
    %41 = vector.multi_reduction <maximumf>, %40, %cst_20 [1] : vector<8x8xf32> to vector<8xf32>
    %42 = vector.shape_cast %41 : vector<8xf32> to vector<8x1xf32>
    %43 = vector.broadcast %42 : vector<8x1xf32> to vector<8x8xf32>
    %44 = arith.subf %40, %43 : vector<8x8xf32>
    %45 = math.exp %44 : vector<8x8xf32>
    %cst_21 = arith.constant dense<0.000000e+00> : vector<8xf32>
    %46 = vector.multi_reduction <add>, %45, %cst_21 [1] : vector<8x8xf32> to vector<8xf32>
    %47 = vector.shape_cast %46 : vector<8xf32> to vector<8x1xf32>
    %48 = tpu.reciprocal %47 {approx = true} : vector<8x1xf32> -> vector<8x1xf32>
    %49 = arith.truncf %45 : vector<8x8xf32> to vector<8x8xbf16>
    %cst_22 = arith.constant dense<0.000000e+00> : vector<8x8xf32>
    %50 = tpu.matmul %49, %39, %cst_22 {dimension_numbers = #tpu.dot_dimension_numbers<[1], [0], [0], [1], [0, 0, 1, 1], [], []>} : vector<8x8xbf16>, vector<8x8xbf16>, vector<8x8xf32> -> vector<8x8xf32>
    %51 = vector.broadcast %48 : vector<8x1xf32> to vector<8x8xf32>
    %52 = arith.mulf %50, %51 : vector<8x8xf32>
    %53 = arith.truncf %52 : vector<8x8xf32> to vector<8x8xbf16>
    %c0_23 = arith.constant 0 : index
    %c0_24 = arith.constant 0 : index
    %54 = vector.load %arg22[%c0_23, %c0_24] : memref<8x32xbf16, #tpu.memory_space<vmem>>, vector<8x8xbf16>
    tpu.vector_store %arg22[%c0_23, %c0_24], %53 {strides = array<i32>} : memref<8x32xbf16, #tpu.memory_space<vmem>>, vector<8x8xbf16>,
    %55 = vector.extract_strided_slice %34 {offsets = [0, 8], sizes = [8, 8], strides = [1, 1]} : vector<8x32xbf16> to vector<8x8xbf16>
    %56 = vector.extract_strided_slice %35 {offsets = [0, 8], sizes = [8, 8], strides = [1, 1]} : vector<8x32xbf16> to vector<8x8xbf16>
    %57 = vector.extract_strided_slice %36 {offsets = [0, 8], sizes = [8, 8], strides = [1, 1]} : vector<8x32xbf16> to vector<8x8xbf16>
    %cst_25 = arith.constant dense<0.000000e+00> : vector<8x8xf32>
    %58 = tpu.matmul %55, %56, %cst_25 {dimension_numbers = #tpu.dot_dimension_numbers<[1], [1], [0], [0], [0, 0, 1, 0], [], []>} : vector<8x8xbf16>, vector<8x8xbf16>, vector<8x8xf32> -> vector<8x8xf32>
    %cst_26 = arith.constant dense<0xFF800000> : vector<8xf32>
    %59 = vector.multi_reduction <maximumf>, %58, %cst_26 [1] : vector<8x8xf32> to vector<8xf32>
    %60 = vector.shape_cast %59 : vector<8xf32> to vector<8x1xf32>
    %61 = vector.broadcast %60 : vector<8x1xf32> to vector<8x8xf32>
    %62 = arith.subf %58, %61 : vector<8x8xf32>
    %63 = math.exp %62 : vector<8x8xf32>
    %cst_27 = arith.constant dense<0.000000e+00> : vector<8xf32>
    %64 = vector.multi_reduction <add>, %63, %cst_27 [1] : vector<8x8xf32> to vector<8xf32>
    %65 = vector.shape_cast %64 : vector<8xf32> to vector<8x1xf32>
    %66 = tpu.reciprocal %65 {approx = true} : vector<8x1xf32> -> vector<8x1xf32>
    %67 = arith.truncf %63 : vector<8x8xf32> to vector<8x8xbf16>
    %cst_28 = arith.constant dense<0.000000e+00> : vector<8x8xf32>
    %68 = tpu.matmul %67, %57, %cst_28 {dimension_numbers = #tpu.dot_dimension_numbers<[1], [0], [0], [1], [0, 0, 1, 1], [], []>} : vector<8x8xbf16>, vector<8x8xbf16>, vector<8x8xf32> -> vector<8x8xf32>
    %69 = vector.broadcast %66 : vector<8x1xf32> to vector<8x8xf32>
    %70 = arith.mulf %68, %69 : vector<8x8xf32>
    %71 = arith.truncf %70 : vector<8x8xf32> to vector<8x8xbf16>
    %c0_29 = arith.constant 0 : index
    %c8 = arith.constant 8 : index
    %72 = vector.load %arg22[%c0_29, %c8] : memref<8x32xbf16, #tpu.memory_space<vmem>>, vector<8x8xbf16>
    tpu.vector_store %arg22[%c0_29, %c8], %71 {strides = array<i32>} : memref<8x32xbf16, #tpu.memory_space<vmem>>, vector<8x8xbf16>,
    %73 = vector.extract_strided_slice %34 {offsets = [0, 16], sizes = [8, 8], strides = [1, 1]} : vector<8x32xbf16> to vector<8x8xbf16>
    %74 = vector.extract_strided_slice %35 {offsets = [0, 16], sizes = [8, 8], strides = [1, 1]} : vector<8x32xbf16> to vector<8x8xbf16>
    %75 = vector.extract_strided_slice %36 {offsets = [0, 16], sizes = [8, 8], strides = [1, 1]} : vector<8x32xbf16> to vector<8x8xbf16>
    %cst_30 = arith.constant dense<0.000000e+00> : vector<8x8xf32>
    %76 = tpu.matmul %73, %74, %cst_30 {dimension_numbers = #tpu.dot_dimension_numbers<[1], [1], [0], [0], [0, 0, 1, 0], [], []>} : vector<8x8xbf16>, vector<8x8xbf16>, vector<8x8xf32> -> vector<8x8xf32>
    %cst_31 = arith.constant dense<0xFF800000> : vector<8xf32>
    %77 = vector.multi_reduction <maximumf>, %76, %cst_31 [1] : vector<8x8xf32> to vector<8xf32>
    %78 = vector.shape_cast %77 : vector<8xf32> to vector<8x1xf32>
    %79 = vector.broadcast %78 : vector<8x1xf32> to vector<8x8xf32>
    %80 = arith.subf %76, %79 : vector<8x8xf32>
    %81 = math.exp %80 : vector<8x8xf32>
    %cst_32 = arith.constant dense<0.000000e+00> : vector<8xf32>
    %82 = vector.multi_reduction <add>, %81, %cst_32 [1] : vector<8x8xf32> to vector<8xf32>
    %83 = vector.shape_cast %82 : vector<8xf32> to vector<8x1xf32>
    %84 = tpu.reciprocal %83 {approx = true} : vector<8x1xf32> -> vector<8x1xf32>
    %85 = arith.truncf %81 : vector<8x8xf32> to vector<8x8xbf16>
    %cst_33 = arith.constant dense<0.000000e+00> : vector<8x8xf32>
    %86 = tpu.matmul %85, %75, %cst_33 {dimension_numbers = #tpu.dot_dimension_numbers<[1], [0], [0], [1], [0, 0, 1, 1], [], []>} : vector<8x8xbf16>, vector<8x8xbf16>, vector<8x8xf32> -> vector<8x8xf32>
    %87 = vector.broadcast %84 : vector<8x1xf32> to vector<8x8xf32>
    %88 = arith.mulf %86, %87 : vector<8x8xf32>
    %89 = arith.truncf %88 : vector<8x8xf32> to vector<8x8xbf16>
    %c0_34 = arith.constant 0 : index
    %c16 = arith.constant 16 : index
    %90 = vector.load %arg22[%c0_34, %c16] : memref<8x32xbf16, #tpu.memory_space<vmem>>, vector<8x8xbf16>
    tpu.vector_store %arg22[%c0_34, %c16], %89 {strides = array<i32>} : memref<8x32xbf16, #tpu.memory_space<vmem>>, vector<8x8xbf16>,
    %91 = vector.extract_strided_slice %34 {offsets = [0, 24], sizes = [8, 8], strides = [1, 1]} : vector<8x32xbf16> to vector<8x8xbf16>
    %92 = vector.extract_strided_slice %35 {offsets = [0, 24], sizes = [8, 8], strides = [1, 1]} : vector<8x32xbf16> to vector<8x8xbf16>
    %93 = vector.extract_strided_slice %36 {offsets = [0, 24], sizes = [8, 8], strides = [1, 1]} : vector<8x32xbf16> to vector<8x8xbf16>
    %cst_35 = arith.constant dense<0.000000e+00> : vector<8x8xf32>
    %94 = tpu.matmul %91, %92, %cst_35 {dimension_numbers = #tpu.dot_dimension_numbers<[1], [1], [0], [0], [0, 0, 1, 0], [], []>} : vector<8x8xbf16>, vector<8x8xbf16>, vector<8x8xf32> -> vector<8x8xf32>
    %cst_36 = arith.constant dense<0xFF800000> : vector<8xf32>
    %95 = vector.multi_reduction <maximumf>, %94, %cst_36 [1] : vector<8x8xf32> to vector<8xf32>
    %96 = vector.shape_cast %95 : vector<8xf32> to vector<8x1xf32>
    %97 = vector.broadcast %96 : vector<8x1xf32> to vector<8x8xf32>
    %98 = arith.subf %94, %97 : vector<8x8xf32>
    %99 = math.exp %98 : vector<8x8xf32>
    %cst_37 = arith.constant dense<0.000000e+00> : vector<8xf32>
    %100 = vector.multi_reduction <add>, %99, %cst_37 [1] : vector<8x8xf32> to vector<8xf32>
    %101 = vector.shape_cast %100 : vector<8xf32> to vector<8x1xf32>
    %102 = tpu.reciprocal %101 {approx = true} : vector<8x1xf32> -> vector<8x1xf32>
    %103 = arith.truncf %99 : vector<8x8xf32> to vector<8x8xbf16>
    %cst_38 = arith.constant dense<0.000000e+00> : vector<8x8xf32>
    %104 = tpu.matmul %103, %93, %cst_38 {dimension_numbers = #tpu.dot_dimension_numbers<[1], [0], [0], [1], [0, 0, 1, 1], [], []>} : vector<8x8xbf16>, vector<8x8xbf16>, vector<8x8xf32> -> vector<8x8xf32>
    %105 = vector.broadcast %102 : vector<8x1xf32> to vector<8x8xf32>
    %106 = arith.mulf %104, %105 : vector<8x8xf32>
    %107 = arith.truncf %106 : vector<8x8xf32> to vector<8x8xbf16>
    %c0_39 = arith.constant 0 : index
    %c24 = arith.constant 24 : index
    %108 = vector.load %arg22[%c0_39, %c24] : memref<8x32xbf16, #tpu.memory_space<vmem>>, vector<8x8xbf16>
    tpu.vector_store %arg22[%c0_39, %c24], %107 {strides = array<i32>} : memref<8x32xbf16, #tpu.memory_space<vmem>>, vector<8x8xbf16>,
    %c0_40 = arith.constant 0 : index
    %c0_41 = arith.constant 0 : index
    %109 = vector.load %arg22[%c0_40, %c0_41] : memref<8x32xbf16, #tpu.memory_space<vmem>>, vector<8x32xbf16>
    %c0_42 = arith.constant 0 : index
    %c0_43 = arith.constant 0 : index
    %110 = vector.load %arg7[%c0_42, %c0_43] : memref<32x32xbf16, #tpu.memory_space<vmem>>, vector<32x32xbf16>
    %cst_44 = arith.constant dense<0.000000e+00> : vector<8x32xf32>
    %111 = tpu.matmul %109, %110, %cst_44 {dimension_numbers = #tpu.dot_dimension_numbers<[1], [0], [0], [1], [0, 0, 1, 1], [], []>} : vector<8x32xbf16>, vector<32x32xbf16>, vector<8x32xf32> -> vector<8x32xf32>
    %c0_45 = arith.constant 0 : index
    %c0_46 = arith.constant 0 : index
    %112 = vector.load %arg8[%c0_45, %c0_46] : memref<1x32xf32, #tpu.memory_space<vmem>>, vector<1x32xf32>
    %113 = vector.broadcast %112 : vector<1x32xf32> to vector<8x32xf32>
    %114 = arith.addf %111, %113 : vector<8x32xf32>
    %115 = arith.addf %1, %114 : vector<8x32xf32>
    %c0_47 = arith.constant 0 : index
    %c0_48 = arith.constant 0 : index
    %116 = vector.load %arg15[%c0_47, %c0_48] : memref<1x32xf32, #tpu.memory_space<vmem>>, vector<1x32xf32>
    %c0_49 = arith.constant 0 : index
    %c0_50 = arith.constant 0 : index
    %117 = vector.load %arg16[%c0_49, %c0_50] : memref<1x32xf32, #tpu.memory_space<vmem>>, vector<1x32xf32>
    %cst_51 = arith.constant dense<0.000000e+00> : vector<8xf32>
    %118 = vector.multi_reduction <add>, %115, %cst_51 [1] : vector<8x32xf32> to vector<8xf32>
    %119 = vector.shape_cast %118 : vector<8xf32> to vector<8x1xf32>
    %cst_52 = arith.constant 3.200000e+01 : f32
    %120 = vector.broadcast %cst_52 : f32 to vector<8x1xf32>
    %121 = arith.divf %119, %120 : vector<8x1xf32>
    %122 = vector.broadcast %121 : vector<8x1xf32> to vector<8x32xf32>
    %123 = arith.subf %115, %122 : vector<8x32xf32>
    %124 = arith.mulf %123, %123 : vector<8x32xf32>
    %cst_53 = arith.constant dense<0.000000e+00> : vector<8xf32>
    %125 = vector.multi_reduction <add>, %124, %cst_53 [1] : vector<8x32xf32> to vector<8xf32>
    %126 = vector.shape_cast %125 : vector<8xf32> to vector<8x1xf32>
    %cst_54 = arith.constant 3.200000e+01 : f32
    %127 = vector.broadcast %cst_54 : f32 to vector<8x1xf32>
    %128 = arith.divf %126, %127 : vector<8x1xf32>
    %129 = vector.broadcast %121 : vector<8x1xf32> to vector<8x32xf32>
    %130 = arith.subf %115, %129 : vector<8x32xf32>
    %cst_55 = arith.constant 9.99999974E-6 : f32
    %131 = vector.broadcast %cst_55 : f32 to vector<8x1xf32>
    %132 = arith.addf %128, %131 : vector<8x1xf32>
    %133 = math.rsqrt %132 : vector<8x1xf32>
    %134 = vector.broadcast %133 : vector<8x1xf32> to vector<8x32xf32>
    %135 = arith.mulf %130, %134 : vector<8x32xf32>
    %136 = vector.broadcast %116 : vector<1x32xf32> to vector<8x32xf32>
    %137 = arith.mulf %135, %136 : vector<8x32xf32>
    %138 = vector.broadcast %117 : vector<1x32xf32> to vector<8x32xf32>
    %139 = arith.addf %137, %138 : vector<8x32xf32>
    %140 = arith.truncf %139 : vector<8x32xf32> to vector<8x32xbf16>
    %c0_56 = arith.constant 0 : index
    %c0_57 = arith.constant 0 : index
    %141 = vector.load %arg9[%c0_56, %c0_57] : memref<32x64xbf16, #tpu.memory_space<vmem>>, vector<32x64xbf16>
    %cst_58 = arith.constant dense<0.000000e+00> : vector<8x64xf32>
    %142 = tpu.matmul %140, %141, %cst_58 {dimension_numbers = #tpu.dot_dimension_numbers<[1], [0], [0], [1], [0, 0, 1, 1], [], []>} : vector<8x32xbf16>, vector<32x64xbf16>, vector<8x64xf32> -> vector<8x64xf32>
    %c0_59 = arith.constant 0 : index
    %c0_60 = arith.constant 0 : index
    %143 = vector.load %arg10[%c0_59, %c0_60] : memref<1x64xf32, #tpu.memory_space<vmem>>, vector<1x64xf32>
    %144 = vector.broadcast %143 : vector<1x64xf32> to vector<8x64xf32>
    %145 = arith.addf %142, %144 : vector<8x64xf32>
    %cst_61 = arith.constant 0.000000e+00 : f32
    %146 = vector.broadcast %cst_61 : f32 to vector<8x64xf32>
    %147 = arith.maximumf %145, %146 : vector<8x64xf32>
    %148 = arith.truncf %147 : vector<8x64xf32> to vector<8x64xbf16>
    %c0_62 = arith.constant 0 : index
    %c0_63 = arith.constant 0 : index
    %149 = vector.load %arg11[%c0_62, %c0_63] : memref<64x32xbf16, #tpu.memory_space<vmem>>, vector<64x32xbf16>
    %cst_64 = arith.constant dense<0.000000e+00> : vector<8x32xf32>
    %150 = tpu.matmul %148, %149, %cst_64 {dimension_numbers = #tpu.dot_dimension_numbers<[1], [0], [0], [1], [0, 0, 1, 1], [], []>} : vector<8x64xbf16>, vector<64x32xbf16>, vector<8x32xf32> -> vector<8x32xf32>
    %c0_65 = arith.constant 0 : index
    %c0_66 = arith.constant 0 : index
    %151 = vector.load %arg12[%c0_65, %c0_66] : memref<1x32xf32, #tpu.memory_space<vmem>>, vector<1x32xf32>
    %152 = vector.broadcast %151 : vector<1x32xf32> to vector<8x32xf32>
    %153 = arith.addf %150, %152 : vector<8x32xf32>
    %154 = arith.addf %115, %153 : vector<8x32xf32>
    %c0_67 = arith.constant 0 : index
    %c0_68 = arith.constant 0 : index
    %c0_69 = arith.constant 0 : index
    %155 = vector.load %arg19[%c0_67, %c0_68, %c0_69] : memref<1x8x32xf32, #tpu.memory_space<vmem>>, vector<1x8x32xf32>
    %156 = vector.shape_cast %155 : vector<1x8x32xf32> to vector<8x32xf32>
    %157 = vector.shape_cast %154 : vector<8x32xf32> to vector<1x8x32xf32>
    tpu.vector_store %arg19[%c0_67, %c0_68, %c0_69], %157 {strides = array<i32>} : memref<1x8x32xf32, #tpu.memory_space<vmem>>, vector<1x8x32xf32>,
    return
  }
  func.func @transform_0(%arg0: i32, %arg1: i32) -> (i32, i32, i32) {
    %c0_i32 = arith.constant 0 : i32
    %c0_i32_0 = arith.constant 0 : i32
    return %arg0, %arg1, %c0_i32 : i32, i32, i32
  }
  func.func @transform_1(%arg0: i32, %arg1: i32) -> (i32, i32, i32) {
    %c0_i32 = arith.constant 0 : i32
    %c0_i32_0 = arith.constant 0 : i32
    %c0_i32_1 = arith.constant 0 : i32
    return %arg0, %c0_i32, %c0_i32_0 : i32, i32, i32
  }
  func.func @transform_2(%arg0: i32, %arg1: i32) -> (i32, i32) {
    %c0_i32 = arith.constant 0 : i32
    %c0_i32_0 = arith.constant 0 : i32
    %c0_i32_1 = arith.constant 0 : i32
    return %c0_i32, %c0_i32_0 : i32, i32
  }
  func.func @transform_3(%arg0: i32, %arg1: i32) -> (i32, i32) {
    %c0_i32 = arith.constant 0 : i32
    %c0_i32_0 = arith.constant 0 : i32
    %c0_i32_1 = arith.constant 0 : i32
    return %c0_i32, %c0_i32_0 : i32, i32
  }
  func.func @transform_4(%arg0: i32, %arg1: i32) -> (i32, i32) {
    %c0_i32 = arith.constant 0 : i32
    %c0_i32_0 = arith.constant 0 : i32
    %c0_i32_1 = arith.constant 0 : i32
    return %c0_i32, %c0_i32_0 : i32, i32
  }
  func.func @transform_5(%arg0: i32, %arg1: i32) -> (i32, i32) {
    %c0_i32 = arith.constant 0 : i32
    %c0_i32_0 = arith.constant 0 : i32
    %c0_i32_1 = arith.constant 0 : i32
    return %c0_i32, %c0_i32_0 : i32, i32
  }
  func.func @transform_6(%arg0: i32, %arg1: i32) -> (i32, i32) {
    %c0_i32 = arith.constant 0 : i32
    %c0_i32_0 = arith.constant 0 : i32
    %c0_i32_1 = arith.constant 0 : i32
    return %c0_i32, %c0_i32_0 : i32, i32
  }
  func.func @transform_7(%arg0: i32, %arg1: i32) -> (i32, i32) {
    %c0_i32 = arith.constant 0 : i32
    %c0_i32_0 = arith.constant 0 : i32
    %c0_i32_1 = arith.constant 0 : i32
    return %c0_i32, %c0_i32_0 : i32, i32
  }
  func.func @transform_8(%arg0: i32, %arg1: i32) -> (i32, i32) {
    %c0_i32 = arith.constant 0 : i32
    %c0_i32_0 = arith.constant 0 : i32
    %c0_i32_1 = arith.constant 0 : i32
    return %c0_i32, %c0_i32_0 : i32, i32
  }
  func.func @transform_9(%arg0: i32, %arg1: i32) -> (i32, i32) {
    %c0_i32 = arith.constant 0 : i32
    %c0_i32_0 = arith.constant 0 : i32
    %c0_i32_1 = arith.constant 0 : i32
    return %c0_i32, %c0_i32_0 : i32, i32
  }
  func.func @transform_10(%arg0: i32, %arg1: i32) -> (i32, i32) {
    %c0_i32 = arith.constant 0 : i32
    %c0_i32_0 = arith.constant 0 : i32
    %c0_i32_1 = arith.constant 0 : i32
    return %c0_i32, %c0_i32_0 : i32, i32
  }
  func.func @transform_11(%arg0: i32, %arg1: i32) -> (i32, i32) {
    %c0_i32 = arith.constant 0 : i32
    %c0_i32_0 = arith.constant 0 : i32
    %c0_i32_1 = arith.constant 0 : i32
    return %c0_i32, %c0_i32_0 : i32, i32
  }
  func.func @transform_12(%arg0: i32, %arg1: i32) -> (i32, i32) {
    %c0_i32 = arith.constant 0 : i32
    %c0_i32_0 = arith.constant 0 : i32
    %c0_i32_1 = arith.constant 0 : i32
    return %c0_i32, %c0_i32_0 : i32, i32
  }
  func.func @transform_13(%arg0: i32, %arg1: i32) -> (i32, i32) {
    %c0_i32 = arith.constant 0 : i32
    %c0_i32_0 = arith.constant 0 : i32
    %c0_i32_1 = arith.constant 0 : i32
    return %c0_i32, %c0_i32_0 : i32, i32
  }
  func.func @transform_14(%arg0: i32, %arg1: i32) -> (i32, i32) {
    %c0_i32 = arith.constant 0 : i32
    %c0_i32_0 = arith.constant 0 : i32
    %c0_i32_1 = arith.constant 0 : i32
    return %c0_i32, %c0_i32_0 : i32, i32
  }
  func.func @transform_15(%arg0: i32, %arg1: i32) -> (i32, i32) {
    %c0_i32 = arith.constant 0 : i32
    %c0_i32_0 = arith.constant 0 : i32
    %c0_i32_1 = arith.constant 0 : i32
    return %c0_i32, %c0_i32_0 : i32, i32
  }
  func.func @transform_16(%arg0: i32, %arg1: i32) -> (i32, i32) {
    %c0_i32 = arith.constant 0 : i32
    %c0_i32_0 = arith.constant 0 : i32
    %c0_i32_1 = arith.constant 0 : i32
    return %c0_i32, %c0_i32_0 : i32, i32
  }
  func.func @transform_17(%arg0: i32, %arg1: i32) -> (i32, i32, i32) {
    %c0_i32 = arith.constant 0 : i32
    %c0_i32_0 = arith.constant 0 : i32
    return %arg0, %arg1, %c0_i32 : i32, i32, i32
  }
}

module attributes {stable_mosaic.version = 11 : i64} {
  func.func @transformer_layer_kernel(%arg0: i32, %arg1: i32, %arg2: memref<1x8x32xf32, #tpu.memory_space<vmem>>, %arg3: memref<1x8x32xf32, #tpu.memory_space<vmem>>, %arg4: memref<32x32xbf16, #tpu.memory_space<vmem>>, %arg5: memref<32x32xbf16, #tpu.memory_space<vmem>>, %arg6: memref<32x32xbf16, #tpu.memory_space<vmem>>, %arg7: memref<32x32xbf16, #tpu.memory_space<vmem>>, %arg8: memref<1x32xf32, #tpu.memory_space<vmem>>, %arg9: memref<32x64xbf16, #tpu.memory_space<vmem>>, %arg10: memref<1x64xf32, #tpu.memory_space<vmem>>, %arg11: memref<64x32xbf16, #tpu.memory_space<vmem>>, %arg12: memref<1x32xf32, #tpu.memory_space<vmem>>, %arg13: memref<1x32xf32, #tpu.memory_space<vmem>>, %arg14: memref<1x32xf32, #tpu.memory_space<vmem>>, %arg15: memref<1x32xf32, #tpu.memory_space<vmem>>, %arg16: memref<1x32xf32, #tpu.memory_space<vmem>>, %arg17: memref<1x32xf32, #tpu.memory_space<vmem>>, %arg18: memref<1x32xf32, #tpu.memory_space<vmem>>, %arg19: memref<1x8x32xf32, #tpu.memory_space<vmem>>, %arg20: memref<8x32xbf16, #tpu.memory_space<vmem>>, %arg21: memref<8x32xbf16, #tpu.memory_space<vmem>>, %arg22: memref<8x32xbf16, #tpu.memory_space<vmem>>) attributes {dimension_semantics = [#tpu.dimension_semantics<parallel>, #tpu.dimension_semantics<arbitrary>], iteration_bounds = array<i64: 2, 1>, scalar_prefetch = 0 : i64, scratch_operands = 3 : i64, tpu.core_type = #tpu.core_type<tc>, window_params = [{transform_indices = @transform_0, window_bounds = array<i64: 1, 8, 32>}, {transform_indices = @transform_1, window_bounds = array<i64: 1, 8, 32>}, {pipeline_mode = #tpu.pipeline_mode<synchronous>, transform_indices = @transform_2, window_bounds = array<i64: 32, 32>}, {pipeline_mode = #tpu.pipeline_mode<synchronous>, transform_indices = @transform_3, window_bounds = array<i64: 32, 32>}, {pipeline_mode = #tpu.pipeline_mode<synchronous>, transform_indices = @transform_4, window_bounds = array<i64: 32, 32>}, {pipeline_mode = #tpu.pipeline_mode<synchronous>, transform_indices = @transform_5, window_bounds = array<i64: 32, 32>}, {pipeline_mode = #tpu.pipeline_mode<synchronous>, transform_indices = @transform_6, window_bounds = array<i64: 1, 32>}, {pipeline_mode = #tpu.pipeline_mode<synchronous>, transform_indices = @transform_7, window_bounds = array<i64: 32, 64>}, {pipeline_mode = #tpu.pipeline_mode<synchronous>, transform_indices = @transform_8, window_bounds = array<i64: 1, 64>}, {pipeline_mode = #tpu.pipeline_mode<synchronous>, transform_indices = @transform_9, window_bounds = array<i64: 64, 32>}, {pipeline_mode = #tpu.pipeline_mode<synchronous>, transform_indices = @transform_10, window_bounds = array<i64: 1, 32>}, {pipeline_mode = #tpu.pipeline_mode<synchronous>, transform_indices = @transform_11, window_bounds = array<i64: 1, 32>}, {pipeline_mode = #tpu.pipeline_mode<synchronous>, transform_indices = @transform_12, window_bounds = array<i64: 1, 32>}, {pipeline_mode = #tpu.pipeline_mode<synchronous>, transform_indices = @transform_13, window_bounds = array<i64: 1, 32>}, {pipeline_mode = #tpu.pipeline_mode<synchronous>, transform_indices = @transform_14, window_bounds = array<i64: 1, 32>}, {pipeline_mode = #tpu.pipeline_mode<synchronous>, transform_indices = @transform_15, window_bounds = array<i64: 1, 32>}, {pipeline_mode = #tpu.pipeline_mode<synchronous>, transform_indices = @transform_16, window_bounds = array<i64: 1, 32>}, {transform_indices = @transform_17, window_bounds = array<i64: 1, 8, 32>}]} {
    %c0 = arith.constant 0 : index
    %c0_0 = arith.constant 0 : index
    %c0_1 = arith.constant 0 : index
    %0 = vector.load %arg2[%c0, %c0_0, %c0_1] : memref<1x8x32xf32, #tpu.memory_space<vmem>>, vector<1x8x32xf32>
    %1 = vector.shape_cast %0 : vector<1x8x32xf32> to vector<8x32xf32>
    %c0_2 = arith.constant 0 : index
    %c0_3 = arith.constant 0 : index
    %2 = vector.load %arg13[%c0_2, %c0_3] : memref<1x32xf32, #tpu.memory_space<vmem>>, vector<1x32xf32>
    %c0_4 = arith.constant 0 : index
    %c0_5 = arith.constant 0 : index
    %3 = vector.load %arg14[%c0_4, %c0_5] : memref<1x32xf32, #tpu.memory_space<vmem>>, vector<1x32xf32>
    %c0_i32 = arith.constant 0 : i32
    %4 = arith.cmpi eq, %arg1, %c0_i32 : i32
    %5 = arith.extui %4 : i1 to i32
    %c0_i32_6 = arith.constant 0 : i32
    %6 = arith.cmpi ne, %5, %c0_i32_6 : i32
    scf.if %6 {
      %c0_79 = arith.constant 0 : index
      %c0_80 = arith.constant 0 : index
      %c0_81 = arith.constant 0 : index
      %182 = vector.load %arg3[%c0_79, %c0_80, %c0_81] : memref<1x8x32xf32, #tpu.memory_space<vmem>>, vector<1x8x32xf32>
      %183 = vector.shape_cast %182 : vector<1x8x32xf32> to vector<8x32xf32>
      %cst_82 = arith.constant dense<0.000000e+00> : vector<8xf32>
      %184 = vector.multi_reduction <add>, %183, %cst_82 [1] : vector<8x32xf32> to vector<8xf32>
      %185 = vector.shape_cast %184 : vector<8xf32> to vector<8x1xf32>
      %cst_83 = arith.constant 3.200000e+01 : f32
      %186 = vector.broadcast %cst_83 : f32 to vector<8x1xf32>
      %187 = arith.divf %185, %186 : vector<8x1xf32>
      %188 = vector.broadcast %187 : vector<8x1xf32> to vector<8x32xf32>
      %189 = arith.subf %183, %188 : vector<8x32xf32>
      %190 = arith.mulf %189, %189 : vector<8x32xf32>
      %cst_84 = arith.constant dense<0.000000e+00> : vector<8xf32>
      %191 = vector.multi_reduction <add>, %190, %cst_84 [1] : vector<8x32xf32> to vector<8xf32>
      %192 = vector.shape_cast %191 : vector<8xf32> to vector<8x1xf32>
      %cst_85 = arith.constant 3.200000e+01 : f32
      %193 = vector.broadcast %cst_85 : f32 to vector<8x1xf32>
      %194 = arith.divf %192, %193 : vector<8x1xf32>
      %195 = vector.broadcast %187 : vector<8x1xf32> to vector<8x32xf32>
      %196 = arith.subf %183, %195 : vector<8x32xf32>
      %cst_86 = arith.constant 9.99999974E-6 : f32
      %197 = vector.broadcast %cst_86 : f32 to vector<8x1xf32>
      %198 = arith.addf %194, %197 : vector<8x1xf32>
      %199 = math.rsqrt %198 : vector<8x1xf32>
      %200 = vector.broadcast %199 : vector<8x1xf32> to vector<8x32xf32>
      %201 = arith.mulf %196, %200 : vector<8x32xf32>
      %202 = vector.broadcast %2 : vector<1x32xf32> to vector<8x32xf32>
      %203 = arith.mulf %201, %202 : vector<8x32xf32>
      %204 = vector.broadcast %3 : vector<1x32xf32> to vector<8x32xf32>
      %205 = arith.addf %203, %204 : vector<8x32xf32>
      %206 = arith.truncf %205 : vector<8x32xf32> to vector<8x32xbf16>
      %c0_87 = arith.constant 0 : index
      %c0_88 = arith.constant 0 : index
      %207 = vector.load %arg5[%c0_87, %c0_88] : memref<32x32xbf16, #tpu.memory_space<vmem>>, vector<32x32xbf16>
      %cst_89 = arith.constant dense<0.000000e+00> : vector<8x32xf32>
      %208 = tpu.matmul %206, %207, %cst_89 {dimension_numbers = #tpu.dot_dimension_numbers<[1], [0], [0], [1], [0, 0, 1, 1], [], []>} : vector<8x32xbf16>, vector<32x32xbf16>, vector<8x32xf32> -> vector<8x32xf32>
      %209 = arith.truncf %208 : vector<8x32xf32> to vector<8x32xbf16>
      %c0_90 = arith.constant 0 : index
      %c0_91 = arith.constant 0 : index
      %210 = vector.load %arg20[%c0_90, %c0_91] : memref<8x32xbf16, #tpu.memory_space<vmem>>, vector<8x32xbf16>
      tpu.vector_store %arg20[%c0_90, %c0_91], %209 {strides = array<i32>} : memref<8x32xbf16, #tpu.memory_space<vmem>>, vector<8x32xbf16>,
      %c0_92 = arith.constant 0 : index
      %c0_93 = arith.constant 0 : index
      %211 = vector.load %arg6[%c0_92, %c0_93] : memref<32x32xbf16, #tpu.memory_space<vmem>>, vector<32x32xbf16>
      %cst_94 = arith.constant dense<0.000000e+00> : vector<8x32xf32>
      %212 = tpu.matmul %206, %211, %cst_94 {dimension_numbers = #tpu.dot_dimension_numbers<[1], [0], [0], [1], [0, 0, 1, 1], [], []>} : vector<8x32xbf16>, vector<32x32xbf16>, vector<8x32xf32> -> vector<8x32xf32>
      %213 = arith.truncf %212 : vector<8x32xf32> to vector<8x32xbf16>
      %c0_95 = arith.constant 0 : index
      %c0_96 = arith.constant 0 : index
      %214 = vector.load %arg21[%c0_95, %c0_96] : memref<8x32xbf16, #tpu.memory_space<vmem>>, vector<8x32xbf16>
      tpu.vector_store %arg21[%c0_95, %c0_96], %213 {strides = array<i32>} : memref<8x32xbf16, #tpu.memory_space<vmem>>, vector<8x32xbf16>,
    } else {
    }
    %cst = arith.constant dense<0.000000e+00> : vector<8xf32>
    %7 = vector.multi_reduction <add>, %1, %cst [1] : vector<8x32xf32> to vector<8xf32>
    %8 = vector.shape_cast %7 : vector<8xf32> to vector<8x1xf32>
    %cst_7 = arith.constant 3.200000e+01 : f32
    %9 = vector.broadcast %cst_7 : f32 to vector<8x1xf32>
    %10 = arith.divf %8, %9 : vector<8x1xf32>
    %11 = vector.broadcast %10 : vector<8x1xf32> to vector<8x32xf32>
    %12 = arith.subf %1, %11 : vector<8x32xf32>
    %13 = arith.mulf %12, %12 : vector<8x32xf32>
    %cst_8 = arith.constant dense<0.000000e+00> : vector<8xf32>
    %14 = vector.multi_reduction <add>, %13, %cst_8 [1] : vector<8x32xf32> to vector<8xf32>
    %15 = vector.shape_cast %14 : vector<8xf32> to vector<8x1xf32>
    %cst_9 = arith.constant 3.200000e+01 : f32
    %16 = vector.broadcast %cst_9 : f32 to vector<8x1xf32>
    %17 = arith.divf %15, %16 : vector<8x1xf32>
    %18 = vector.broadcast %10 : vector<8x1xf32> to vector<8x32xf32>
    %19 = arith.subf %1, %18 : vector<8x32xf32>
    %cst_10 = arith.constant 9.99999974E-6 : f32
    %20 = vector.broadcast %cst_10 : f32 to vector<8x1xf32>
    %21 = arith.addf %17, %20 : vector<8x1xf32>
    %22 = math.rsqrt %21 : vector<8x1xf32>
    %23 = vector.broadcast %22 : vector<8x1xf32> to vector<8x32xf32>
    %24 = arith.mulf %19, %23 : vector<8x32xf32>
    %25 = vector.broadcast %2 : vector<1x32xf32> to vector<8x32xf32>
    %26 = arith.mulf %24, %25 : vector<8x32xf32>
    %27 = vector.broadcast %3 : vector<1x32xf32> to vector<8x32xf32>
    %28 = arith.addf %26, %27 : vector<8x32xf32>
    %29 = arith.truncf %28 : vector<8x32xf32> to vector<8x32xbf16>
    %c0_11 = arith.constant 0 : index
    %c0_12 = arith.constant 0 : index
    %30 = vector.load %arg4[%c0_11, %c0_12] : memref<32x32xbf16, #tpu.memory_space<vmem>>, vector<32x32xbf16>
    %cst_13 = arith.constant dense<0.000000e+00> : vector<8x32xf32>
    %31 = tpu.matmul %29, %30, %cst_13 {dimension_numbers = #tpu.dot_dimension_numbers<[1], [0], [0], [1], [0, 0, 1, 1], [], []>} : vector<8x32xbf16>, vector<32x32xbf16>, vector<8x32xf32> -> vector<8x32xf32>
    %cst_14 = arith.constant 0.353553385 : f32
    %32 = vector.broadcast %cst_14 : f32 to vector<8x32xf32>
    %33 = arith.mulf %31, %32 : vector<8x32xf32>
    %34 = arith.truncf %33 : vector<8x32xf32> to vector<8x32xbf16>
    %c0_15 = arith.constant 0 : index
    %c0_16 = arith.constant 0 : index
    %35 = vector.load %arg20[%c0_15, %c0_16] : memref<8x32xbf16, #tpu.memory_space<vmem>>, vector<8x32xbf16>
    %c0_17 = arith.constant 0 : index
    %c0_18 = arith.constant 0 : index
    %36 = vector.load %arg21[%c0_17, %c0_18] : memref<8x32xbf16, #tpu.memory_space<vmem>>, vector<8x32xbf16>
    %37 = vector.extract_strided_slice %34 {offsets = [0, 0], sizes = [8, 8], strides = [1, 1]} : vector<8x32xbf16> to vector<8x8xbf16>
    %38 = vector.extract_strided_slice %35 {offsets = [0, 0], sizes = [8, 8], strides = [1, 1]} : vector<8x32xbf16> to vector<8x8xbf16>
    %39 = vector.extract_strided_slice %36 {offsets = [0, 0], sizes = [8, 8], strides = [1, 1]} : vector<8x32xbf16> to vector<8x8xbf16>
    %cst_19 = arith.constant dense<0.000000e+00> : vector<8x8xf32>
    %40 = tpu.matmul %37, %38, %cst_19 {dimension_numbers = #tpu.dot_dimension_numbers<[1], [1], [0], [0], [0, 0, 1, 0], [], []>} : vector<8x8xbf16>, vector<8x8xbf16>, vector<8x8xf32> -> vector<8x8xf32>
    %cst_20 = arith.constant dense<0xFF800000> : vector<8xf32>
    %41 = vector.multi_reduction <maximumf>, %40, %cst_20 [1] : vector<8x8xf32> to vector<8xf32>
    %42 = vector.shape_cast %41 : vector<8xf32> to vector<8x1xf32>
    %43 = vector.broadcast %42 : vector<8x1xf32> to vector<8x8xf32>
    %44 = arith.subf %40, %43 : vector<8x8xf32>
    %45 = math.exp %44 : vector<8x8xf32>
    %cst_21 = arith.constant dense<0.000000e+00> : vector<8xf32>
    %46 = vector.multi_reduction <add>, %45, %cst_21 [1] : vector<8x8xf32> to vector<8xf32>
    %47 = vector.shape_cast %46 : vector<8xf32> to vector<8x1xf32>
    %48 = tpu.reciprocal %47 {approx = true} : vector<8x1xf32> -> vector<8x1xf32>
    %49 = arith.truncf %45 : vector<8x8xf32> to vector<8x8xbf16>
    %cst_22 = arith.constant dense<0.000000e+00> : vector<8x8xf32>
    %50 = tpu.matmul %49, %39, %cst_22 {dimension_numbers = #tpu.dot_dimension_numbers<[1], [0], [0], [1], [0, 0, 1, 1], [], []>} : vector<8x8xbf16>, vector<8x8xbf16>, vector<8x8xf32> -> vector<8x8xf32>
    %51 = vector.broadcast %48 : vector<8x1xf32> to vector<8x8xf32>
    %52 = arith.mulf %50, %51 : vector<8x8xf32>
    %53 = arith.truncf %52 : vector<8x8xf32> to vector<8x8xbf16>
    %c0_23 = arith.constant 0 : index
    %c0_24 = arith.constant 0 : index
    %54 = vector.load %arg22[%c0_23, %c0_24] : memref<8x32xbf16, #tpu.memory_space<vmem>>, vector<8x8xbf16>
    tpu.vector_store %arg22[%c0_23, %c0_24], %53 {strides = array<i32>} : memref<8x32xbf16, #tpu.memory_space<vmem>>, vector<8x8xbf16>,
    %55 = vector.extract_strided_slice %34 {offsets = [0, 8], sizes = [8, 8], strides = [1, 1]} : vector<8x32xbf16> to vector<8x8xbf16>
    %56 = vector.extract_strided_slice %35 {offsets = [0, 8], sizes = [8, 8], strides = [1, 1]} : vector<8x32xbf16> to vector<8x8xbf16>
    %57 = vector.extract_strided_slice %36 {offsets = [0, 8], sizes = [8, 8], strides = [1, 1]} : vector<8x32xbf16> to vector<8x8xbf16>
    %cst_25 = arith.constant dense<0.000000e+00> : vector<8x8xf32>
    %58 = tpu.matmul %55, %56, %cst_25 {dimension_numbers = #tpu.dot_dimension_numbers<[1], [1], [0], [0], [0, 0, 1, 0], [], []>} : vector<8x8xbf16>, vector<8x8xbf16>, vector<8x8xf32> -> vector<8x8xf32>
    %cst_26 = arith.constant dense<0xFF800000> : vector<8xf32>
    %59 = vector.multi_reduction <maximumf>, %58, %cst_26 [1] : vector<8x8xf32> to vector<8xf32>
    %60 = vector.shape_cast %59 : vector<8xf32> to vector<8x1xf32>
    %61 = vector.broadcast %60 : vector<8x1xf32> to vector<8x8xf32>
    %62 = arith.subf %58, %61 : vector<8x8xf32>
    %63 = math.exp %62 : vector<8x8xf32>
    %cst_27 = arith.constant dense<0.000000e+00> : vector<8xf32>
    %64 = vector.multi_reduction <add>, %63, %cst_27 [1] : vector<8x8xf32> to vector<8xf32>
    %65 = vector.shape_cast %64 : vector<8xf32> to vector<8x1xf32>
    %66 = tpu.reciprocal %65 {approx = true} : vector<8x1xf32> -> vector<8x1xf32>
    %67 = arith.truncf %63 : vector<8x8xf32> to vector<8x8xbf16>
    %cst_28 = arith.constant dense<0.000000e+00> : vector<8x8xf32>
    %68 = tpu.matmul %67, %57, %cst_28 {dimension_numbers = #tpu.dot_dimension_numbers<[1], [0], [0], [1], [0, 0, 1, 1], [], []>} : vector<8x8xbf16>, vector<8x8xbf16>, vector<8x8xf32> -> vector<8x8xf32>
    %69 = vector.broadcast %66 : vector<8x1xf32> to vector<8x8xf32>
    %70 = arith.mulf %68, %69 : vector<8x8xf32>
    %71 = arith.truncf %70 : vector<8x8xf32> to vector<8x8xbf16>
    %c0_29 = arith.constant 0 : index
    %c8 = arith.constant 8 : index
    %72 = vector.load %arg22[%c0_29, %c8] : memref<8x32xbf16, #tpu.memory_space<vmem>>, vector<8x8xbf16>
    tpu.vector_store %arg22[%c0_29, %c8], %71 {strides = array<i32>} : memref<8x32xbf16, #tpu.memory_space<vmem>>, vector<8x8xbf16>,
    %73 = vector.extract_strided_slice %34 {offsets = [0, 16], sizes = [8, 8], strides = [1, 1]} : vector<8x32xbf16> to vector<8x8xbf16>
    %74 = vector.extract_strided_slice %35 {offsets = [0, 16], sizes = [8, 8], strides = [1, 1]} : vector<8x32xbf16> to vector<8x8xbf16>
    %75 = vector.extract_strided_slice %36 {offsets = [0, 16], sizes = [8, 8], strides = [1, 1]} : vector<8x32xbf16> to vector<8x8xbf16>
    %cst_30 = arith.constant dense<0.000000e+00> : vector<8x8xf32>
    %76 = tpu.matmul %73, %74, %cst_30 {dimension_numbers = #tpu.dot_dimension_numbers<[1], [1], [0], [0], [0, 0, 1, 0], [], []>} : vector<8x8xbf16>, vector<8x8xbf16>, vector<8x8xf32> -> vector<8x8xf32>
    %cst_31 = arith.constant dense<0xFF800000> : vector<8xf32>
    %77 = vector.multi_reduction <maximumf>, %76, %cst_31 [1] : vector<8x8xf32> to vector<8xf32>
    %78 = vector.shape_cast %77 : vector<8xf32> to vector<8x1xf32>
    %79 = vector.broadcast %78 : vector<8x1xf32> to vector<8x8xf32>
    %80 = arith.subf %76, %79 : vector<8x8xf32>
    %81 = math.exp %80 : vector<8x8xf32>
    %cst_32 = arith.constant dense<0.000000e+00> : vector<8xf32>
    %82 = vector.multi_reduction <add>, %81, %cst_32 [1] : vector<8x8xf32> to vector<8xf32>
    %83 = vector.shape_cast %82 : vector<8xf32> to vector<8x1xf32>
    %84 = tpu.reciprocal %83 {approx = true} : vector<8x1xf32> -> vector<8x1xf32>
    %85 = arith.truncf %81 : vector<8x8xf32> to vector<8x8xbf16>
    %cst_33 = arith.constant dense<0.000000e+00> : vector<8x8xf32>
    %86 = tpu.matmul %85, %75, %cst_33 {dimension_numbers = #tpu.dot_dimension_numbers<[1], [0], [0], [1], [0, 0, 1, 1], [], []>} : vector<8x8xbf16>, vector<8x8xbf16>, vector<8x8xf32> -> vector<8x8xf32>
    %87 = vector.broadcast %84 : vector<8x1xf32> to vector<8x8xf32>
    %88 = arith.mulf %86, %87 : vector<8x8xf32>
    %89 = arith.truncf %88 : vector<8x8xf32> to vector<8x8xbf16>
    %c0_34 = arith.constant 0 : index
    %c16 = arith.constant 16 : index
    %90 = vector.load %arg22[%c0_34, %c16] : memref<8x32xbf16, #tpu.memory_space<vmem>>, vector<8x8xbf16>
    tpu.vector_store %arg22[%c0_34, %c16], %89 {strides = array<i32>} : memref<8x32xbf16, #tpu.memory_space<vmem>>, vector<8x8xbf16>,
    %91 = vector.extract_strided_slice %34 {offsets = [0, 24], sizes = [8, 8], strides = [1, 1]} : vector<8x32xbf16> to vector<8x8xbf16>
    %92 = vector.extract_strided_slice %35 {offsets = [0, 24], sizes = [8, 8], strides = [1, 1]} : vector<8x32xbf16> to vector<8x8xbf16>
    %93 = vector.extract_strided_slice %36 {offsets = [0, 24], sizes = [8, 8], strides = [1, 1]} : vector<8x32xbf16> to vector<8x8xbf16>
    %cst_35 = arith.constant dense<0.000000e+00> : vector<8x8xf32>
    %94 = tpu.matmul %91, %92, %cst_35 {dimension_numbers = #tpu.dot_dimension_numbers<[1], [1], [0], [0], [0, 0, 1, 0], [], []>} : vector<8x8xbf16>, vector<8x8xbf16>, vector<8x8xf32> -> vector<8x8xf32>
    %cst_36 = arith.constant dense<0xFF800000> : vector<8xf32>
    %95 = vector.multi_reduction <maximumf>, %94, %cst_36 [1] : vector<8x8xf32> to vector<8xf32>
    %96 = vector.shape_cast %95 : vector<8xf32> to vector<8x1xf32>
    %97 = vector.broadcast %96 : vector<8x1xf32> to vector<8x8xf32>
    %98 = arith.subf %94, %97 : vector<8x8xf32>
    %99 = math.exp %98 : vector<8x8xf32>
    %cst_37 = arith.constant dense<0.000000e+00> : vector<8xf32>
    %100 = vector.multi_reduction <add>, %99, %cst_37 [1] : vector<8x8xf32> to vector<8xf32>
    %101 = vector.shape_cast %100 : vector<8xf32> to vector<8x1xf32>
    %102 = tpu.reciprocal %101 {approx = true} : vector<8x1xf32> -> vector<8x1xf32>
    %103 = arith.truncf %99 : vector<8x8xf32> to vector<8x8xbf16>
    %cst_38 = arith.constant dense<0.000000e+00> : vector<8x8xf32>
    %104 = tpu.matmul %103, %93, %cst_38 {dimension_numbers = #tpu.dot_dimension_numbers<[1], [0], [0], [1], [0, 0, 1, 1], [], []>} : vector<8x8xbf16>, vector<8x8xbf16>, vector<8x8xf32> -> vector<8x8xf32>
    %105 = vector.broadcast %102 : vector<8x1xf32> to vector<8x8xf32>
    %106 = arith.mulf %104, %105 : vector<8x8xf32>
    %107 = arith.truncf %106 : vector<8x8xf32> to vector<8x8xbf16>
    %c0_39 = arith.constant 0 : index
    %c24 = arith.constant 24 : index
    %108 = vector.load %arg22[%c0_39, %c24] : memref<8x32xbf16, #tpu.memory_space<vmem>>, vector<8x8xbf16>
    tpu.vector_store %arg22[%c0_39, %c24], %107 {strides = array<i32>} : memref<8x32xbf16, #tpu.memory_space<vmem>>, vector<8x8xbf16>,
    %c0_40 = arith.constant 0 : index
    %c0_41 = arith.constant 0 : index
    %109 = vector.load %arg22[%c0_40, %c0_41] : memref<8x32xbf16, #tpu.memory_space<vmem>>, vector<8x32xbf16>
    %c0_42 = arith.constant 0 : index
    %c0_43 = arith.constant 0 : index
    %110 = vector.load %arg7[%c0_42, %c0_43] : memref<32x32xbf16, #tpu.memory_space<vmem>>, vector<32x32xbf16>
    %cst_44 = arith.constant dense<0.000000e+00> : vector<8x32xf32>
    %111 = tpu.matmul %109, %110, %cst_44 {dimension_numbers = #tpu.dot_dimension_numbers<[1], [0], [0], [1], [0, 0, 1, 1], [], []>} : vector<8x32xbf16>, vector<32x32xbf16>, vector<8x32xf32> -> vector<8x32xf32>
    %c0_45 = arith.constant 0 : index
    %c0_46 = arith.constant 0 : index
    %112 = vector.load %arg8[%c0_45, %c0_46] : memref<1x32xf32, #tpu.memory_space<vmem>>, vector<1x32xf32>
    %113 = vector.broadcast %112 : vector<1x32xf32> to vector<8x32xf32>
    %114 = arith.addf %111, %113 : vector<8x32xf32>
    %115 = arith.addf %1, %114 : vector<8x32xf32>
    %c0_47 = arith.constant 0 : index
    %c0_48 = arith.constant 0 : index
    %116 = vector.load %arg15[%c0_47, %c0_48] : memref<1x32xf32, #tpu.memory_space<vmem>>, vector<1x32xf32>
    %c0_49 = arith.constant 0 : index
    %c0_50 = arith.constant 0 : index
    %117 = vector.load %arg16[%c0_49, %c0_50] : memref<1x32xf32, #tpu.memory_space<vmem>>, vector<1x32xf32>
    %cst_51 = arith.constant dense<0.000000e+00> : vector<8xf32>
    %118 = vector.multi_reduction <add>, %115, %cst_51 [1] : vector<8x32xf32> to vector<8xf32>
    %119 = vector.shape_cast %118 : vector<8xf32> to vector<8x1xf32>
    %cst_52 = arith.constant 3.200000e+01 : f32
    %120 = vector.broadcast %cst_52 : f32 to vector<8x1xf32>
    %121 = arith.divf %119, %120 : vector<8x1xf32>
    %122 = vector.broadcast %121 : vector<8x1xf32> to vector<8x32xf32>
    %123 = arith.subf %115, %122 : vector<8x32xf32>
    %124 = arith.mulf %123, %123 : vector<8x32xf32>
    %cst_53 = arith.constant dense<0.000000e+00> : vector<8xf32>
    %125 = vector.multi_reduction <add>, %124, %cst_53 [1] : vector<8x32xf32> to vector<8xf32>
    %126 = vector.shape_cast %125 : vector<8xf32> to vector<8x1xf32>
    %cst_54 = arith.constant 3.200000e+01 : f32
    %127 = vector.broadcast %cst_54 : f32 to vector<8x1xf32>
    %128 = arith.divf %126, %127 : vector<8x1xf32>
    %129 = vector.broadcast %121 : vector<8x1xf32> to vector<8x32xf32>
    %130 = arith.subf %115, %129 : vector<8x32xf32>
    %cst_55 = arith.constant 9.99999974E-6 : f32
    %131 = vector.broadcast %cst_55 : f32 to vector<8x1xf32>
    %132 = arith.addf %128, %131 : vector<8x1xf32>
    %133 = math.rsqrt %132 : vector<8x1xf32>
    %134 = vector.broadcast %133 : vector<8x1xf32> to vector<8x32xf32>
    %135 = arith.mulf %130, %134 : vector<8x32xf32>
    %136 = vector.broadcast %116 : vector<1x32xf32> to vector<8x32xf32>
    %137 = arith.mulf %135, %136 : vector<8x32xf32>
    %138 = vector.broadcast %117 : vector<1x32xf32> to vector<8x32xf32>
    %139 = arith.addf %137, %138 : vector<8x32xf32>
    %140 = arith.truncf %139 : vector<8x32xf32> to vector<8x32xbf16>
    %c0_56 = arith.constant 0 : index
    %c0_57 = arith.constant 0 : index
    %141 = vector.load %arg9[%c0_56, %c0_57] : memref<32x64xbf16, #tpu.memory_space<vmem>>, vector<32x64xbf16>
    %cst_58 = arith.constant dense<0.000000e+00> : vector<8x64xf32>
    %142 = tpu.matmul %140, %141, %cst_58 {dimension_numbers = #tpu.dot_dimension_numbers<[1], [0], [0], [1], [0, 0, 1, 1], [], []>} : vector<8x32xbf16>, vector<32x64xbf16>, vector<8x64xf32> -> vector<8x64xf32>
    %c0_59 = arith.constant 0 : index
    %c0_60 = arith.constant 0 : index
    %143 = vector.load %arg10[%c0_59, %c0_60] : memref<1x64xf32, #tpu.memory_space<vmem>>, vector<1x64xf32>
    %144 = vector.broadcast %143 : vector<1x64xf32> to vector<8x64xf32>
    %145 = arith.addf %142, %144 : vector<8x64xf32>
    %cst_61 = arith.constant 0.000000e+00 : f32
    %146 = vector.broadcast %cst_61 : f32 to vector<8x64xf32>
    %147 = arith.maximumf %145, %146 : vector<8x64xf32>
    %148 = arith.truncf %147 : vector<8x64xf32> to vector<8x64xbf16>
    %c0_62 = arith.constant 0 : index
    %c0_63 = arith.constant 0 : index
    %149 = vector.load %arg11[%c0_62, %c0_63] : memref<64x32xbf16, #tpu.memory_space<vmem>>, vector<64x32xbf16>
    %cst_64 = arith.constant dense<0.000000e+00> : vector<8x32xf32>
    %150 = tpu.matmul %148, %149, %cst_64 {dimension_numbers = #tpu.dot_dimension_numbers<[1], [0], [0], [1], [0, 0, 1, 1], [], []>} : vector<8x64xbf16>, vector<64x32xbf16>, vector<8x32xf32> -> vector<8x32xf32>
    %c0_65 = arith.constant 0 : index
    %c0_66 = arith.constant 0 : index
    %151 = vector.load %arg12[%c0_65, %c0_66] : memref<1x32xf32, #tpu.memory_space<vmem>>, vector<1x32xf32>
    %152 = vector.broadcast %151 : vector<1x32xf32> to vector<8x32xf32>
    %153 = arith.addf %150, %152 : vector<8x32xf32>
    %154 = arith.addf %115, %153 : vector<8x32xf32>
    %c0_67 = arith.constant 0 : index
    %c0_68 = arith.constant 0 : index
    %155 = vector.load %arg17[%c0_67, %c0_68] : memref<1x32xf32, #tpu.memory_space<vmem>>, vector<1x32xf32>
    %c0_69 = arith.constant 0 : index
    %c0_70 = arith.constant 0 : index
    %156 = vector.load %arg18[%c0_69, %c0_70] : memref<1x32xf32, #tpu.memory_space<vmem>>, vector<1x32xf32>
    %cst_71 = arith.constant dense<0.000000e+00> : vector<8xf32>
    %157 = vector.multi_reduction <add>, %154, %cst_71 [1] : vector<8x32xf32> to vector<8xf32>
    %158 = vector.shape_cast %157 : vector<8xf32> to vector<8x1xf32>
    %cst_72 = arith.constant 3.200000e+01 : f32
    %159 = vector.broadcast %cst_72 : f32 to vector<8x1xf32>
    %160 = arith.divf %158, %159 : vector<8x1xf32>
    %161 = vector.broadcast %160 : vector<8x1xf32> to vector<8x32xf32>
    %162 = arith.subf %154, %161 : vector<8x32xf32>
    %163 = arith.mulf %162, %162 : vector<8x32xf32>
    %cst_73 = arith.constant dense<0.000000e+00> : vector<8xf32>
    %164 = vector.multi_reduction <add>, %163, %cst_73 [1] : vector<8x32xf32> to vector<8xf32>
    %165 = vector.shape_cast %164 : vector<8xf32> to vector<8x1xf32>
    %cst_74 = arith.constant 3.200000e+01 : f32
    %166 = vector.broadcast %cst_74 : f32 to vector<8x1xf32>
    %167 = arith.divf %165, %166 : vector<8x1xf32>
    %168 = vector.broadcast %160 : vector<8x1xf32> to vector<8x32xf32>
    %169 = arith.subf %154, %168 : vector<8x32xf32>
    %cst_75 = arith.constant 9.99999974E-6 : f32
    %170 = vector.broadcast %cst_75 : f32 to vector<8x1xf32>
    %171 = arith.addf %167, %170 : vector<8x1xf32>
    %172 = math.rsqrt %171 : vector<8x1xf32>
    %173 = vector.broadcast %172 : vector<8x1xf32> to vector<8x32xf32>
    %174 = arith.mulf %169, %173 : vector<8x32xf32>
    %175 = vector.broadcast %155 : vector<1x32xf32> to vector<8x32xf32>
    %176 = arith.mulf %174, %175 : vector<8x32xf32>
    %177 = vector.broadcast %156 : vector<1x32xf32> to vector<8x32xf32>
    %178 = arith.addf %176, %177 : vector<8x32xf32>
    %c0_76 = arith.constant 0 : index
    %c0_77 = arith.constant 0 : index
    %c0_78 = arith.constant 0 : index
    %179 = vector.load %arg19[%c0_76, %c0_77, %c0_78] : memref<1x8x32xf32, #tpu.memory_space<vmem>>, vector<1x8x32xf32>
    %180 = vector.shape_cast %179 : vector<1x8x32xf32> to vector<8x32xf32>
    %181 = vector.shape_cast %178 : vector<8x32xf32> to vector<1x8x32xf32>
    tpu.vector_store %arg19[%c0_76, %c0_77, %c0_78], %181 {strides = array<i32>} : memref<1x8x32xf32, #tpu.memory_space<vmem>>, vector<1x8x32xf32>,
    return
  }
  func.func @transform_0(%arg0: i32, %arg1: i32) -> (i32, i32, i32) {
    %c0_i32 = arith.constant 0 : i32
    %c0_i32_0 = arith.constant 0 : i32
    return %arg0, %arg1, %c0_i32 : i32, i32, i32
  }
  func.func @transform_1(%arg0: i32, %arg1: i32) -> (i32, i32, i32) {
    %c0_i32 = arith.constant 0 : i32
    %c0_i32_0 = arith.constant 0 : i32
    %c0_i32_1 = arith.constant 0 : i32
    return %arg0, %c0_i32, %c0_i32_0 : i32, i32, i32
  }
  func.func @transform_2(%arg0: i32, %arg1: i32) -> (i32, i32) {
    %c0_i32 = arith.constant 0 : i32
    %c0_i32_0 = arith.constant 0 : i32
    %c0_i32_1 = arith.constant 0 : i32
    return %c0_i32, %c0_i32_0 : i32, i32
  }
  func.func @transform_3(%arg0: i32, %arg1: i32) -> (i32, i32) {
    %c0_i32 = arith.constant 0 : i32
    %c0_i32_0 = arith.constant 0 : i32
    %c0_i32_1 = arith.constant 0 : i32
    return %c0_i32, %c0_i32_0 : i32, i32
  }
  func.func @transform_4(%arg0: i32, %arg1: i32) -> (i32, i32) {
    %c0_i32 = arith.constant 0 : i32
    %c0_i32_0 = arith.constant 0 : i32
    %c0_i32_1 = arith.constant 0 : i32
    return %c0_i32, %c0_i32_0 : i32, i32
  }
  func.func @transform_5(%arg0: i32, %arg1: i32) -> (i32, i32) {
    %c0_i32 = arith.constant 0 : i32
    %c0_i32_0 = arith.constant 0 : i32
    %c0_i32_1 = arith.constant 0 : i32
    return %c0_i32, %c0_i32_0 : i32, i32
  }
  func.func @transform_6(%arg0: i32, %arg1: i32) -> (i32, i32) {
    %c0_i32 = arith.constant 0 : i32
    %c0_i32_0 = arith.constant 0 : i32
    %c0_i32_1 = arith.constant 0 : i32
    return %c0_i32, %c0_i32_0 : i32, i32
  }
  func.func @transform_7(%arg0: i32, %arg1: i32) -> (i32, i32) {
    %c0_i32 = arith.constant 0 : i32
    %c0_i32_0 = arith.constant 0 : i32
    %c0_i32_1 = arith.constant 0 : i32
    return %c0_i32, %c0_i32_0 : i32, i32
  }
  func.func @transform_8(%arg0: i32, %arg1: i32) -> (i32, i32) {
    %c0_i32 = arith.constant 0 : i32
    %c0_i32_0 = arith.constant 0 : i32
    %c0_i32_1 = arith.constant 0 : i32
    return %c0_i32, %c0_i32_0 : i32, i32
  }
  func.func @transform_9(%arg0: i32, %arg1: i32) -> (i32, i32) {
    %c0_i32 = arith.constant 0 : i32
    %c0_i32_0 = arith.constant 0 : i32
    %c0_i32_1 = arith.constant 0 : i32
    return %c0_i32, %c0_i32_0 : i32, i32
  }
  func.func @transform_10(%arg0: i32, %arg1: i32) -> (i32, i32) {
    %c0_i32 = arith.constant 0 : i32
    %c0_i32_0 = arith.constant 0 : i32
    %c0_i32_1 = arith.constant 0 : i32
    return %c0_i32, %c0_i32_0 : i32, i32
  }
  func.func @transform_11(%arg0: i32, %arg1: i32) -> (i32, i32) {
    %c0_i32 = arith.constant 0 : i32
    %c0_i32_0 = arith.constant 0 : i32
    %c0_i32_1 = arith.constant 0 : i32
    return %c0_i32, %c0_i32_0 : i32, i32
  }
  func.func @transform_12(%arg0: i32, %arg1: i32) -> (i32, i32) {
    %c0_i32 = arith.constant 0 : i32
    %c0_i32_0 = arith.constant 0 : i32
    %c0_i32_1 = arith.constant 0 : i32
    return %c0_i32, %c0_i32_0 : i32, i32
  }
  func.func @transform_13(%arg0: i32, %arg1: i32) -> (i32, i32) {
    %c0_i32 = arith.constant 0 : i32
    %c0_i32_0 = arith.constant 0 : i32
    %c0_i32_1 = arith.constant 0 : i32
    return %c0_i32, %c0_i32_0 : i32, i32
  }
  func.func @transform_14(%arg0: i32, %arg1: i32) -> (i32, i32) {
    %c0_i32 = arith.constant 0 : i32
    %c0_i32_0 = arith.constant 0 : i32
    %c0_i32_1 = arith.constant 0 : i32
    return %c0_i32, %c0_i32_0 : i32, i32
  }
  func.func @transform_15(%arg0: i32, %arg1: i32) -> (i32, i32) {
    %c0_i32 = arith.constant 0 : i32
    %c0_i32_0 = arith.constant 0 : i32
    %c0_i32_1 = arith.constant 0 : i32
    return %c0_i32, %c0_i32_0 : i32, i32
  }
  func.func @transform_16(%arg0: i32, %arg1: i32) -> (i32, i32) {
    %c0_i32 = arith.constant 0 : i32
    %c0_i32_0 = arith.constant 0 : i32
    %c0_i32_1 = arith.constant 0 : i32
    return %c0_i32, %c0_i32_0 : i32, i32
  }
  func.func @transform_17(%arg0: i32, %arg1: i32) -> (i32, i32, i32) {
    %c0_i32 = arith.constant 0 : i32
    %c0_i32_0 = arith.constant 0 : i32
    return %arg0, %arg1, %c0_i32 : i32, i32, i32
  }
}

</mosaic_0001>

<bundles_post_ra>
// kernel: _lambda_.2
= control target key start
LH: loop header
LB: loop body
LE: loop exit
PB: predicated region body
PF: predicated region fallthrough
CT: control target
= control target key end

     0   :  { %s2711_s0 = inlined_call_operand.vmem [shape: f32[2,8,32], index: 0, kind: input, shape index: {}, may-alias: {0,1}]   ;;  %s2712_s1 = inlined_call_operand.vmem [shape: f32[2,8,32], index: 1, kind: input, shape index: {}, may-alias: {0,1}]   ;;  %s2713_s2 = inlined_call_operand.vmem [shape: bf16[32,32], index: 2, kind: input, shape index: {}]   ;;  %s2714_s3 = inlined_call_operand.vmem [shape: bf16[32,32], index: 3, kind: input, shape index: {}]   ;;  %s2715_s4 = inlined_call_operand.hbm [shape: bf16[32,32], index: 4, kind: input, shape index: {}]   ;;  %s2716_s5 = inlined_call_operand.hbm [shape: bf16[32,32], index: 5, kind: input, shape index: {}]   ;;  %s2717_s6 = inlined_call_operand.vmem [shape: f32[1,32], index: 6, kind: input, shape index: {}]   ;;  %s2718_s7 = inlined_call_operand.hbm [shape: bf16[32,64], index: 7, kind: input, shape index: {}]   ;;  %s2719_s8 = inlined_call_operand.vmem [shape: f32[1,64], index: 8, kind: input, shape index: {}]   ;;  %s2720_s9 = inlined_call_operand.vmem [shape: bf16[64,32], index: 9, kind: input, shape index: {}]   ;;  %s2721_s10 = inlined_call_operand.vmem [shape: f32[1,32], index: 10, kind: input, shape index: {}]   ;;  %s2722_s11 = inlined_call_operand.vmem [shape: f32[1,32], index: 11, kind: input, shape index: {}]   ;;  %s2723_s12 = inlined_call_operand.hbm [shape: f32[1,32], index: 12, kind: input, shape index: {}]   ;;  %s2724_s13 = inlined_call_operand.hbm [shape: f32[1,32], index: 13, kind: input, shape index: {}]   ;;  %s2725_s14 = inlined_call_operand.hbm [shape: f32[1,32], index: 14, kind: input, shape index: {}]   ;;  %s2726_s15 = inlined_call_operand.vmem [shape: f32[1,32], index: 15, kind: input, shape index: {}]   ;;  %s2727_s16 = inlined_call_operand.vmem [shape: f32[1,32], index: 16, kind: input, shape index: {}]   ;;  %s2728_s17 = inlined_call_operand.vmem [shape: f32[2,8,32], index: 17, kind: output, shape index: {}]  }
   0x1   :  { %2736 = sst [smem:[#allocation20_spill]] %s2711_s0 }
   0x2   :  { %2737 = sst [smem:[#allocation21_spill]] %s2712_s1 }
   0x3   :  { %2738 = sst [smem:[#allocation22_spill]] %s2715_s4 }
   0x4   :  { %22 = vsyncpa [#allocation6], 0 }
   0x5   :  { %23 = vsyncpa [#allocation8], 0 }
   0x6   :  { %24 = vsyncpa [#allocation11], 0 }
   0x7   :  { %25 = vsyncpa [#allocation14], 0  ;;  %s2433_s24 = smov 0   ;;  %s2435_s25 = smov 0  }
   0x8   :  { %s2437_s26 = smov 0  }
   0x9 LB: > { %2739 = sst [smem:[#allocation19_spill]] %s2321_s25  ;;  %s1797_s15 = sadd.s32 4294967295, %s2325_s26   ;;  %s2325_s26 = sphi %s2437_s26, %s31_s26   ;;  %s2321_s25 = sphi %s2435_s25, %s2751_s25   ;;  %s2317_s24 = sphi %s2433_s24, %s2750_s24  }
   0xa   : > { %p1799_p0 = scmp.ge.s32.totalorder %s2325_s26, 1  ;;  %p445_p1 = scmp.lt.s32.totalorder %s2325_s26, 3 }
   0xb   : > { %p2451_p2 = scmp.eq.s32.totalorder %s1797_s15, 0  ;;  %s2327_s28 = smov [#allocation7]  }
   0xc   : > { %p2455_p3 = pnand %p1799_p0, %p445_p1  ;;  %s476_s29 = sshll.u32 %s2327_s28, 4  ;;  %s477_s29 = int_to_ptr.vmem [resolvable:$true] %s476_s29 }
   0xd   : > { %s2740_s16 = scalar_select %p2451_p2, 1, 0 }
   0xe   : > { %p2022_p4 = pneg %p2455_p3  ;;  %s2328_s0 = smov [#allocation10]  }
   0xf   : > { %s518_s30 = sshll.u32 %s2328_s0, 4  ;;  %s43_s19 = sadd.s32 1, %s2321_s25  ;;  %s519_s30 = int_to_ptr.vmem [resolvable:$true] %s518_s30 }
  0x10   : > { %p2463_p5 = pnand %p2451_p2, %p2022_p4  ;;  %s2142_s20 = scalar_lea.vmem %s477_s29, 256 }
  0x11   : > { %p2143_p7 = scmp.ne.s32.totalorder %s477_s29, %s2142_s20  ;;  %p2150_p10 = scmp.lt.s32.totalorder %s477_s29, %s477_s29 }
  0x12   : > { %p2470_p6 = pneg %p2463_p5  ;;  %p2151_p11 = scmp.lt.s32.totalorder %s2142_s20, %s2142_s20 }
  0x14   : > { %p2145_p8 = pnand %p2143_p7, %p2470_p6  ;;  %p2152_p12 = por %p2151_p11, %p2150_p10 }
  0x16   : > { %p2146_p9 = pneg %p2145_p8 }
  0x18   : > { %p2153_p13 = pnand %p2152_p12, %p2146_p9 }
  0x1a   : > { %2156 = shalt.err (!%p2153_p13)
}
  0x1b   : > { %s2730_s21 = smov 64   ;;  %s2732_s22 = smov 4  }
  0x1c   : > { %2028 = dma.hbm_to_vmem [thread:$0]  (!%p2463_p5), %s2716_s5, 256, %s477_s29, [#allocation8], %s2730_s21, %s2730_s21, %s2732_s22  }
  0x1d   : > { %s2168_s28 = scalar_lea.vmem %s519_s30, 16  ;;  %s2175_s0 = scalar_lea.vmem %s519_s30, 32 }
  0x1e   : > { %p2169_p0 = scmp.ne.s32.totalorder %s519_s30, %s2168_s28  ;;  %p2176_p7 = scmp.lt.s32.totalorder %s519_s30, %s519_s30 }
  0x1f   : > { %p2177_p8 = scmp.lt.s32.totalorder %s2175_s0, %s2168_s28 }
  0x20   : > { %p2171_p1 = pnand %p2169_p0, %p2470_p6 }
  0x21   : > { %p2178_p9 = por %p2177_p8, %p2176_p7 }
  0x22   : > { %p2172_p4 = pneg %p2171_p1 }
  0x24   : > { %p2179_p10 = pnand %p2178_p9, %p2172_p4 }
  0x26   : > { %2182 = shalt.err (!%p2179_p10)
}
  0x27   : > { %2034 = dma.hbm_to_vmem [thread:$0]  (!%p2463_p5), %s2723_s12, 16, %s519_s30, [#allocation11]  }
  0x28   : > { %p45_p11 = scmp.ge.s32.totalorder %s43_s19, 2  ;;  %s2331_s29 = smov [#allocation5]  }
  0x29   : > { %s463_s23 = sshll.u32 %s2331_s29, 4  ;;  %s2332_s15 = smov [#allocation9]   ;;  %s464_s23 = int_to_ptr.vmem [resolvable:$true] %s463_s23 }
  0x2a   : > { %s2753_s19 = smov (%p45_p11, %s43_s19), 0  ;;  %s492_s21 = sshll.u32 %s2332_s15, 4  ;;  %s493_s21 = int_to_ptr.vmem [resolvable:$true] %s492_s21 }
  0x2b   : > { %s2194_s22 = scalar_lea.vmem %s464_s23, 256  ;;  %p2202_p1 = scmp.lt.s32.totalorder %s464_s23, %s464_s23 }
  0x2c   : > { %p2195_p12 = scmp.ne.s32.totalorder %s464_s23, %s2194_s22  ;;  %p2203_p4 = scmp.lt.s32.totalorder %s2194_s22, %s2194_s22 }
  0x2e   : > { %p2197_p13 = pnand %p2195_p12, %p2470_p6  ;;  %p2204_p7 = por %p2203_p4, %p2202_p1 }
  0x30   : > { %p2198_p0 = pneg %p2197_p13 }
  0x32   : > { %p2205_p8 = pnand %p2204_p7, %p2198_p0 }
  0x34   : > { %2208 = shalt.err (!%p2205_p8)
}
  0x35   : > { %s2744_s25 = smov 4   ;;  %s2745_s30 = smov 64  }
  0x36   : > { %s2746_s4 = sld [smem:[#allocation22_spill]]  ;;  %s2220_s20 = scalar_lea.vmem %s493_s21, 256 }
  0x37   : > { %p2221_p9 = scmp.ne.s32.totalorder %s493_s21, %s2220_s20  ;;  %p2228_p12 = scmp.lt.s32.totalorder %s493_s21, %s493_s21 }
  0x38   : > { %p2229_p13 = scmp.lt.s32.totalorder %s2220_s20, %s2220_s20 }
  0x39   : > { %p2223_p10 = pnand %p2221_p9, %p2470_p6 }
  0x3a   : > { %p2230_p0 = por %p2229_p13, %p2228_p12 }
  0x3b   : > { %p2224_p11 = pneg %p2223_p10 }
  0x3c   : > { %2025 = dma.hbm_to_vmem [thread:$0]  (!%p2463_p5), %s2746_s4, 256, %s464_s23, [#allocation6], %s2745_s30, %s2745_s30, %s2744_s25  }
  0x3d   : > { %p2231_p1 = pnand %p2230_p0, %p2224_p11 }
  0x3f   : > { %2234 = shalt.err (!%p2231_p1)
}
  0x40   : > { %2031 = dma.hbm_to_vmem [thread:$0]  (!%p2463_p5), %s2718_s7, 256, %s493_s21, [#allocation8], %s2745_s30, %s2745_s30, %s2744_s25  }
  0x41   : > { %s2333_s23 = smov [#allocation12]   ;;  %s2334_s28 = smov [#allocation13]  }
  0x42   : > { %s529_s15 = sshll.u32 %s2333_s23, 4  ;;  %s540_s0 = sshll.u32 %s2334_s28, 4  ;;  %s530_s15 = int_to_ptr.vmem [resolvable:$true] %s529_s15  ;;  %s541_s0 = int_to_ptr.vmem [resolvable:$true] %s540_s0 }
  0x43   : > { %s2246_s4 = scalar_lea.vmem %s530_s15, 16  ;;  %s2253_s20 = scalar_lea.vmem %s530_s15, 32 }
  0x44   : > { %p2247_p4 = scmp.ne.s32.totalorder %s530_s15, %s2246_s4  ;;  %p2254_p9 = scmp.lt.s32.totalorder %s530_s15, %s530_s15 }
  0x45   : > { %p2255_p10 = scmp.lt.s32.totalorder %s2253_s20, %s2246_s4 }
  0x46   : > { %p2249_p7 = pnand %p2247_p4, %p2470_p6 }
  0x47   : > { %p2256_p11 = por %p2255_p10, %p2254_p9 }
  0x48   : > { %p2250_p8 = pneg %p2249_p7 }
  0x4a   : > { %p2257_p12 = pnand %p2256_p11, %p2250_p8 }
  0x4c   : > { %2260 = shalt.err (!%p2257_p12)
}
  0x4d   : > { %2037 = dma.hbm_to_vmem [thread:$0]  (!%p2463_p5), %s2724_s13, 16, %s530_s15, [#allocation11]  }
  0x4e   : > { %s2272_s25 = scalar_lea.vmem %s541_s0, 16  ;;  %s2279_s30 = scalar_lea.vmem %s541_s0, 32 }
  0x4f   : > { %p2273_p13 = scmp.ne.s32.totalorder %s541_s0, %s2272_s25  ;;  %p2280_p4 = scmp.lt.s32.totalorder %s541_s0, %s541_s0 }
  0x50   : > { %p2281_p7 = scmp.lt.s32.totalorder %s2279_s30, %s2272_s25 }
  0x51   : > { %p2275_p0 = pnand %p2273_p13, %p2470_p6 }
  0x52   : > { %p2282_p2 = por %p2281_p7, %p2280_p4 }
  0x53   : > { %p2276_p1 = pneg %p2275_p0 }
  0x55   : > { %p2283_p9 = pnand %p2282_p2, %p2276_p1 }
  0x57   : > { %2286 = shalt.err (!%p2283_p9)
}
  0x58   : > { %2040 = dma.hbm_to_vmem [thread:$0]  (!%p2463_p5), %s2725_s14, 16, %s541_s0, [#allocation14]  }
  0x59   : > { %576 = sbr.rel (%p2455_p3) target bundleno = 2344 (0x928), region = 88  ;;  %p2747_p8 = scmp.ne.s32.totalorder (!%p2455_p3), %s2740_s16, 0 }
  0x5e   : > { %2300 = dma.done.wait (%p2747_p8), [#allocation6], 256  }
  0x5f   : > { %2302 = vsyncadd (%p2747_p8), [#allocation6], 4294967040 }
  0x60   : > { %2304 = dma.done.wait (%p2747_p8), [#allocation8], 512  }
  0x61   : > { %2306 = vsyncadd (%p2747_p8), [#allocation8], 4294966784 }
  0x62   : > { %2308 = dma.done.wait (%p2747_p8), [#allocation11], 32  }
  0x63   : > { %2310 = vsyncadd (%p2747_p8), [#allocation11], 4294967264 }
  0x64   : > { %2312 = dma.done.wait (%p2747_p8), [#allocation14], 16  }
  0x65   : > { %2314 = vsyncadd (%p2747_p8), [#allocation14], 4294967280  ;;  %p656_p2 = scmp.lt.s32.totalorder %s2317_s24, 1  ;;  %s2748_s23 = sld [smem:[#allocation21_spill]]  ;;  %vm683_vm0 = vcmask 261120   ;;  %v2093_v14 = vld [vmem:[%s2714_s3 + $0x8] sm:$0xff]  }
  0x66   : > { %s2749_s20 = sld [smem:[#allocation20_spill]]  ;;  %v2094_v15 = vld [vmem:[#allocation5 + $0x8] sm:$0xff]   ;;  %v2335_v16 = vmov 0.0   ;;  %v2095_v17 = vld [vmem:[%s2714_s3] sm:$0xff]   ;;  %v2096_v18 = vld [vmem:[#allocation5] sm:$0xff]   ;;  %vm2336_vm1 = vmmov 0  }
  0x67   : > { %s2755_s24 = smov (!%p656_p2, %s2317_s24), 1  ;;  %1898 = vmatprep.subr.bf16.mxu0 %v2335_v16  ;;  %1906 = vmatprep.subr.bf16.mxu1 %v2335_v16  ;;  %v1860_v26 = vld [vmem:[%s2722_s11] ss:$0 sm:$0xff]  ;;  %v1861_v28 = vld [vmem:[#allocation10] ss:$0 sm:$0xff]  ;;  %v2097_v33 = vld [vmem:[%s2713_s2 + $0x8] sm:$0xff]  }
  0x68   : > { %s2547_s27 = sshll.u32 %s2755_s24, 3  ;;  %1899 = vmatpush3.bf16.msra.mxu0 %v2093_v14  ;;  %1907 = vmatpush3.bf16.msra.mxu1 %v2094_v15  ;;  %v2098_v36 = vld [vmem:[%s2713_s2] sm:$0xff]   ;;  %vm773_vm2 = vcmask 257024   ;;  %vm926_vm3 = vcmask 64512   ;;  %vm987_vm4 = vcmask 1043456   ;;  %s2338_s28 = smov 104  }
  0x69   : > { %1900 = vmatprep.subr.bf16.mxu0 %v2335_v16  ;;  %1908 = vmatprep.subr.bf16.mxu1 %v2335_v16  ;;  %s2339_s0 = smov 112   ;;  %vm1033_vm5 = vcmask 60416   ;;  %s2342_s24 = smov 24   ;;  %vm1159_vm6 = vcmask 126016   ;;  %vm1278_vm7 = vcmask 191616   ;;  %vm1397_vm8 = vcmask 257216  }
  0x6a   : > { %1902 = vmatprep.mubr.msk.bf16.mxu0 %vm2336_vm1, %v2335_v16  ;;  %1910 = vmatprep.mubr.msk.bf16.mxu1 %vm2336_vm1, %v2335_v16  ;;  %vm1604_vm9 = vcmask 523264   ;;  %s673_s21 = scalar_lea.vmem %s2728_s17, %s2547_s27 }
  0x6b   : > { %s666_s15 = scalar_lea.vmem %s2748_s23, %s2547_s27 }
  0x6c   : > { %s662_s22 = scalar_lea.vmem %s2749_s20, %s2547_s27  ;;  %v682_v0 = vld [vmem:[%s666_s15] sm:$0xff]  ;;  %1901 = vmatpush3.bf16.msra.mxu0 %v2095_v17  ;;  %1909 = vmatpush3.bf16.msra.mxu1 %v2096_v18  ;;  %s2337_s15 = smov 120  }
  0x6d   : > { %v2557_v1 = vld [vmem:[%s662_s22] sm:$0xff]  ;;  %v684_v2 = vsel %vm683_vm0, %v682_v0, 0.0  ;;  %1914 = vmatprep.subr.bf16.mxu0 %v2335_v16  ;;  %1922 = vmatprep.subr.bf16.mxu1 %v2335_v16  ;;  %s2340_s20 = smov 8   ;;  %s2341_s22 = smov 16  }
  0x6e   : > { %v834_v3 = vsel %vm683_vm0, %v2557_v1, 0.0  ;;  %685 = vadd.xlane.f32.xlu0 %v684_v2 }
  0x72   : > { %835 = vadd.xlane.f32.xlu0 %v834_v3 }
  0xf7   : > { %v686_v4 = vpop.xlane.xlu0 %685 }
  0xf8   : > { %v688_v5 = vmul.f32 0.03125, %v686_v4 }
  0xfa   : > { %v689_v6 = vsub.f32 %v682_v0, %v688_v5 }
  0xfb   : > { %v836_v7 = vpop.xlane.xlu0 %835 }
  0xfc   : > { %v838_v8 = vmul.f32 0.03125, %v836_v7  ;;  %v690_v9 = vmul.f32 %v689_v6, %v689_v6 }
  0xfe   : > { %v839_v10 = vsub.f32 %v2557_v1, %v838_v8  ;;  %v691_v11 = vsel %vm683_vm0, %v690_v9, 0.0 }
  0xff   : > { %692 = vadd.xlane.f32.xlu1 %v691_v11 }
 0x100   : > { %v840_v12 = vmul.f32 %v839_v10, %v839_v10 }
 0x102   : > { %v841_v13 = vsel %vm683_vm0, %v840_v12, 0.0 }
 0x103   : > { %842 = vadd.xlane.f32.xlu1 %v841_v13 }
 0x188   : > { %v693_v19 = vpop.xlane.xlu1 %692 }
 0x189   : > { %v694_v20 = vmul.f32 0.03125, %v693_v19 }
 0x18b   : > { %v695_v21 = vadd.f32 1e-05, %v694_v20 }
 0x18c   : > { %v843_v22 = vpop.xlane.xlu1 %842 }
 0x18d   : > { %2109 = vrsqrt.f32 %v695_v21  ;;  %v844_v23 = vmul.f32 0.03125, %v843_v22 }
 0x18f   : > { %v845_v24 = vadd.f32 1e-05, %v844_v23 }
 0x191   : > { %2111 = vrsqrt.f32 %v845_v24 }
 0x19a   : > { %v2110_v25 = vpop.eup %2109 }
 0x19b   : > { %v697_v27 = vmul.f32 %v2110_v25, %v689_v6 }
 0x19d   : > { %v704_v29 = vmul.f32 %v1860_v26, %v697_v27 }
 0x19e   : > { %v2112_v30 = vpop.eup %2111 }
 0x19f   : > { %v711_v31 = vadd.f32 %v1861_v28, %v704_v29  ;;  %v847_v32 = vmul.f32 %v2112_v30, %v839_v10 }
 0x1a1   : > { %v712_v34 = vpack.c.bf16 %v711_v31, %v711_v31  ;;  %v854_v35 = vmul.f32 %v1860_v26, %v847_v32 }
 0x1a3   : > { %1903 = vmatmul.mubr.msk.bf16.vlgmr.msra.gmra.mxu0 %vm683_vm0, %v712_v34  ;;  %1911 = vmatmul.mubr.msk.bf16.vlgmr.msra.gmra.mxu1 %vm683_vm0, %v712_v34  ;;  %v861_v37 = vadd.f32 %v1861_v28, %v854_v35 }
 0x1a4   : > { %1915 = vmatpush3.bf16.msra.mxu0 %v2097_v33  ;;  %1918 = vmatprep.mubr.msk.bf16.mxu0 %vm2336_vm1, %v2335_v16 }
 0x1a5   : > { %1916 = vmatprep.subr.bf16.mxu0 %v2335_v16  ;;  %1924 = vmatprep.mubr.msk.bf16.mxu1 %vm2336_vm1, %v2335_v16  ;;  %v862_v38 = vpack.c.bf16 %v861_v37, %v861_v37 }
 0x1a8   : > { %1917 = vmatpush3.bf16.msra.mxu0 %v2098_v36 }
 0x1a9   : > { %1928 = vmatprep.subr.bf16.mxu0 %v2335_v16 }
 0x1ab   : > { %1919 = vmatmul.mubr.msk.bf16.vlgmr.msra.gmra.mxu0 %vm683_vm0, %v862_v38 }
 0x1ac   : > { %1930 = vmatprep.mubr.msk.bf16.mxu0 %vm2336_vm1, %v2335_v16 }
 0x263   : > { %v766_v39 = vpop.f32.mrf.mxu0  ;;  %v825_v40 = vpop.f32.mrf.mxu1 }
 0x264   : > { %v772_v41 = vpack.c.bf16 %v766_v39, %v766_v39  ;;  %v831_v42 = vpack.c.bf16 %v825_v40, %v825_v40 }
 0x265   : > { %v1904_v43 = vpop.f32.mrf.mxu0  ;;  %v1912_v44 = vpop.f32.mrf.mxu1 }
 0x266   : > { %774 = vst.msk [vmem:[#allocation2] sm:$0xf] %vm773_vm2, %v772_v41  ;;  %832 = vst.msk [vmem:[#allocation3] sm:$0xf] %vm773_vm2, %v831_v42 }
 0x267   : > { %v769_v45 = vpop.f32.mrf.mxu0  ;;  %v828_v46 = vpop.f32.mrf.mxu1 }
 0x269   : > { %v1905_v47 = vpop.f32.mrf.mxu0  ;;  %v1913_v48 = vpop.f32.mrf.mxu1 }
 0x26b   : > { %v916_v49 = vpop.f32.mrf.mxu0 }
 0x26c   : > { %v922_v50 = vmul.f32 0.35355338, %v916_v49 }
 0x26d   : > { %v1920_v51 = vpop.f32.mrf.mxu0  ;;  %v924_v52 = vld [vmem:[#allocation2] sm:$0xf]  ;;  %v2601_v53 = vld [vmem:[#allocation3] sm:$0xf] }
 0x26e   : > { %v923_v54 = vpack.c.bf16 %v922_v50, %v922_v50  ;;  %v931_v55 = vsel %vm926_vm3, %v924_v52, 0  ;;  %v989_v56 = vsel %vm987_vm4, %v2601_v53, 0  ;;  %v1828_v57 = vcombine.low %v924_v52, %v924_v52 }
 0x26f   : > { %v919_v58 = vpop.f32.mrf.mxu0  ;;  %1923 = vmatpush3.bf16.xpose.msra.mxu1 %v931_v55  ;;  %1929 = vmatpush3.bf16.msra.mxu0 %v989_v56  ;;  %v1830_v24 = vcombine.low %v2601_v53, %v2601_v53 }
 0x270   : > { %1041 = vrot.lane.b32.xlu0 %v1828_v57, %s2337_s15  ;;  %1036 = vrot.lane.b32.xlu1 %v923_v54, %s2337_s15 }
 0x271   : > { %v1921_v59 = vpop.f32.mrf.mxu0  ;;  %1934 = vmatprep.subr.bf16.mxu1 %v2335_v16  ;;  %1940 = vmatprep.subr.bf16.mxu0 %v2335_v16 }
 0x274   : > { %1282 = vrot.lane.b32.xlu0 %v1828_v57, %s2338_s28  ;;  %1163 = vrot.lane.b32.xlu1 %v1828_v57, %s2339_s0 }
 0x276   : > { %1925 = vmatmul.mubr.msk.bf16.vlgmr.msra.gmra.mxu1 %vm926_vm3, %v923_v54 }
 0x277   : > { %1936 = vmatprep.mubr.msk.bf16.mxu1 %vm2336_vm1, %v2335_v16 }
 0x278   : > { %1161 = vrot.lane.b32.xlu1 %v923_v54, %s2339_s0 }
 0x27c   : > { %1280 = vrot.lane.b32.xlu1 %v923_v54, %s2338_s28 }
 0x2e2   : > { %v1037_v60 = vpop.permute.xlu1 %1036  ;;  %v1042_v61 = vpop.permute.xlu0 %1041 }
 0x2e3   : > { %v1047_v62 = vsel %vm926_vm3, %v1042_v61, 0 }
 0x2e4   : > { %1935 = vmatpush3.bf16.xpose.msra.mxu1 %v1047_v62 }
 0x2e5   : > { %1946 = vmatprep.subr.bf16.mxu1 %v2335_v16 }
 0x2e6   : > { %v1164_v63 = vpop.permute.xlu1 %1163  ;;  %v1283_v2 = vpop.permute.xlu0 %1282 }
 0x2e7   : > { %v1169_v0 = vsel %vm926_vm3, %v1164_v63, 0  ;;  %v1288_v4 = vsel %vm926_vm3, %v1283_v2, 0 }
 0x2ea   : > { %v1162_v3 = vpop.permute.xlu1 %1161 }
 0x2eb   : > { %1937 = vmatmul.mubr.msk.bf16.vlgmr.msra.gmra.mxu1 %vm926_vm3, %v1037_v60 }
 0x2ec   : > { %1947 = vmatpush3.bf16.xpose.msra.mxu1 %v1169_v0  ;;  %1948 = vmatprep.mubr.msk.bf16.mxu1 %vm2336_vm1, %v2335_v16 }
 0x2ed   : > { %1958 = vmatprep.subr.bf16.mxu1 %v2335_v16 }
 0x2ee   : > { %v1281_v5 = vpop.permute.xlu1 %1280 }
 0x2f3   : > { %1949 = vmatmul.mubr.msk.bf16.vlgmr.msra.gmra.mxu1 %vm926_vm3, %v1162_v3 }
 0x2f4   : > { %1959 = vmatpush3.bf16.xpose.msra.mxu1 %v1288_v4  ;;  %1960 = vmatprep.mubr.msk.bf16.mxu1 %vm2336_vm1, %v2335_v16 }
 0x2f5   : > { %1970 = vmatprep.subr.bf16.mxu1 %v2335_v16 }
 0x2fb   : > { %1961 = vmatmul.mubr.msk.bf16.vlgmr.msra.gmra.mxu1 %vm926_vm3, %v1281_v5 }
 0x2fc   : > { %1974 = vmatprep.mubr.msk.bf16.mxu1 %vm2336_vm1, %v2335_v16 }
 0x336   : > { %v967_v6 = vpop.f32.mrf.mxu1 }
 0x337   : > { %v973_v7 = vsel %vm926_vm3, %v967_v6, -inf }
 0x338   : > { %974 = vmax.xlane.f32.xlu0 %v973_v7  ;;  %v1926_v8 = vpop.f32.mrf.mxu1 }
 0x33a   : > { %v970_v9 = vpop.f32.mrf.mxu1 }
 0x33c   : > { %v1927_v10 = vpop.f32.mrf.mxu1 }
 0x3ab   : > { %v1083_v11 = vpop.f32.mrf.mxu1 }
 0x3ac   : > { %v1089_v12 = vsel %vm926_vm3, %v1083_v11, -inf }
 0x3ad   : > { %1090 = vmax.xlane.f32.xlu1 %v1089_v12  ;;  %v1938_v13 = vpop.f32.mrf.mxu1 }
 0x3af   : > { %v1086_v14 = vpop.f32.mrf.mxu1 }
 0x3b1   : > { %v1939_v15 = vpop.f32.mrf.mxu1 }
 0x3b2   : > { %v2101_v15 = vld [vmem:[#allocation7 + $0x8] sm:$0xff]  }
 0x3b3   : > { %v1205_v17 = vpop.f32.mrf.mxu1  ;;  %1971 = vmatpush3.bf16.msra.mxu1 %v2101_v15 }
 0x3b4   : > { %v1211_v18 = vsel %vm926_vm3, %v1205_v17, -inf  ;;  %1972 = vmatprep.subr.bf16.mxu1 %v2335_v16 }
 0x3b5   : > { %1212 = vmax.xlane.f32.xlu0 %v1211_v18  ;;  %v1950_v19 = vpop.f32.mrf.mxu1 }
 0x3b6   : > { %v2102_v19 = vld [vmem:[#allocation7] sm:$0xff]  }
 0x3b7   : > { %v1208_v20 = vpop.f32.mrf.mxu1  ;;  %1973 = vmatpush3.bf16.msra.mxu1 %v2102_v19 }
 0x3b8   : > { %1986 = vmatprep.subr.bf16.mxu1 %v2335_v16 }
 0x3b9   : > { %v1951_v21 = vpop.f32.mrf.mxu1 }
 0x3bb   : > { %v1324_v22 = vpop.f32.mrf.mxu1 }
 0x3bc   : > { %v1330_v23 = vsel %vm926_vm3, %v1324_v22, -inf }
 0x3bd   : > { %1331 = vmax.xlane.f32.xlu0 %v1330_v23  ;;  %v1962_v25 = vpop.f32.mrf.mxu1 }
 0x3be   : > { %1222 = vrot.lane.b32.xlu1 %v1830_v24, %s2339_s0 }
 0x3bf   : > { %v1327_v26 = vpop.f32.mrf.mxu1 }
 0x3c1   : > { %v1963_v27 = vpop.f32.mrf.mxu1  ;;  %v975_v28 = vpop.xlane.xlu0 %974 }
 0x3c2   : > { %v976_v29 = vsub.f32 %v967_v6, %v975_v28  ;;  %1341 = vrot.lane.b32.xlu1 %v1830_v24, %s2338_s28 }
 0x3c4   : > { %v977_v30 = vmul.f32 1.442695, %v976_v29 }
 0x3c6   : > { %2113 = vpow2.f32 %v977_v30 }
 0x3d3   : > { %v2114_v31 = vpop.eup %2113  ;;  %1103 = vrot.lane.b32.xlu0 %v1830_v24, %s2337_s15 }
 0x3d4   : > { %v983_v32 = vpack.c.bf16 %v2114_v31, %v2114_v31  ;;  %v979_v56 = vsel %vm926_vm3, %v2114_v31, 0.0 }
 0x3d6   : > { %1931 = vmatmul.mubr.msk.bf16.vlgmr.msra.gmra.mxu0 %vm926_vm3, %v983_v32 }
 0x3d7   : > { %1942 = vmatprep.mubr.msk.bf16.mxu0 %vm2336_vm1, %v2335_v16 }
 0x436   : > { %v1091_v33 = vpop.xlane.xlu1 %1090 }
 0x437   : > { %v1092_v34 = vsub.f32 %v1083_v11, %v1091_v33 }
 0x439   : > { %v1093_v35 = vmul.f32 1.442695, %v1092_v34  ;;  %v1839_v34 = vld [vmem:[%s2717_s6] ss:$0 sm:$0xff] }
 0x43a   : > { %v1223_v46 = vpop.permute.xlu1 %1222 }
 0x43b   : > { %2115 = vpow2.f32 %v1093_v35  ;;  %v1228_v48 = vsel %vm987_vm4, %v1223_v46, 0 }
 0x43e   : > { %v1213_v36 = vpop.xlane.xlu0 %1212  ;;  %v1342_v51 = vpop.permute.xlu1 %1341 }
 0x43f   : > { %v1214_v37 = vsub.f32 %v1205_v17, %v1213_v36  ;;  %v1347_v53 = vsel %vm987_vm4, %v1342_v51, 0 }
 0x441   : > { %v1215_v38 = vmul.f32 1.442695, %v1214_v37 }
 0x443   : > { %2117 = vpow2.f32 %v1215_v38 }
 0x446   : > { %v1332_v39 = vpop.xlane.xlu0 %1331 }
 0x447   : > { %v1333_v40 = vsub.f32 %v1324_v22, %v1332_v39 }
 0x448   : > { %v2116_v41 = vpop.eup %2115 }
 0x449   : > { %v1334_v42 = vmul.f32 1.442695, %v1333_v40  ;;  %v1095_v43 = vsel %vm926_vm3, %v2116_v41, 0.0  ;;  %v1099_v47 = vpack.c.bf16 %v2116_v41, %v2116_v41 }
 0x44a   : > { %1096 = vadd.xlane.f32.xlu1 %v1095_v43  ;;  %v1104_v44 = vpop.permute.xlu0 %1103 }
 0x44b   : > { %2119 = vpow2.f32 %v1334_v42  ;;  %v1109_v45 = vsel %vm987_vm4, %v1104_v44, 0 }
 0x44c   : > { %1941 = vmatpush3.bf16.msra.mxu0 %v1109_v45 }
 0x44d   : > { %1952 = vmatprep.subr.bf16.mxu0 %v2335_v16 }
 0x44f   : > { %1943 = vmatmul.mubr.msk.bf16.vlgmr.msra.gmra.mxu0 %vm926_vm3, %v1099_v47  ;;  %v2103_v47 = vld [vmem:[#allocation9 + $0x8] sm:$0xff]  }
 0x450   : > { %v2118_v49 = vpop.eup %2117  ;;  %1953 = vmatpush3.bf16.msra.mxu0 %v1228_v48  ;;  %1954 = vmatprep.mubr.msk.bf16.mxu0 %vm2336_vm1, %v2335_v16  ;;  %v2104_v48 = vld [vmem:[#allocation9] sm:$0xff]  }
 0x451   : > { %v1217_v50 = vsel %vm926_vm3, %v2118_v49, 0.0  ;;  %1964 = vmatprep.subr.bf16.mxu0 %v2335_v16  ;;  %v1221_v52 = vpack.c.bf16 %v2118_v49, %v2118_v49  ;;  %v2106_v49 = vld [vmem:[%s2720_s9 + $0x10] sm:$0xff]  }
 0x452   : > { %1218 = vadd.xlane.f32.xlu0 %v1217_v50 }
 0x457   : > { %1955 = vmatmul.mubr.msk.bf16.vlgmr.msra.gmra.mxu0 %vm926_vm3, %v1221_v52 }
 0x458   : > { %v2120_v54 = vpop.eup %2119  ;;  %1965 = vmatpush3.bf16.msra.mxu0 %v1347_v53  ;;  %1966 = vmatprep.mubr.msk.bf16.mxu0 %vm2336_vm1, %v2335_v16 }
 0x459   : > { %v1336_v55 = vsel %vm926_vm3, %v2120_v54, 0.0  ;;  %1978 = vmatprep.subr.bf16.mxu0 %v2335_v16  ;;  %v1340_v57 = vpack.c.bf16 %v2120_v54, %v2120_v54  ;;  %v1843_v54 = vld [vmem:[#allocation12] ss:$0 sm:$0xff] }
 0x45a   : > { %1337 = vadd.xlane.f32.xlu0 %v1336_v55 }
 0x45e   : > { %980 = vadd.xlane.f32.xlu0 %v979_v56  ;;  %v1844_v56 = vld [vmem:[#allocation13] ss:$0 sm:$0xff] }
 0x45f   : > { %1967 = vmatmul.mubr.msk.bf16.vlgmr.msra.gmra.mxu0 %vm926_vm3, %v1340_v57 }
 0x460   : > { %1982 = vmatprep.mubr.msk.bf16.mxu0 %vm2336_vm1, %v2335_v16  ;;  %1979 = vmatpush3.bf16.msra.mxu0 %v2103_v47 }
 0x461   : > { %1980 = vmatprep.subr.bf16.mxu0 %v2335_v16 }
 0x464   : > { %1981 = vmatpush3.bf16.msra.mxu0 %v2104_v48 }
 0x496   : > { %v1025_v58 = vpop.f32.mrf.mxu0 }
 0x498   : > { %v1932_v59 = vpop.f32.mrf.mxu0 }
 0x49a   : > { %v1028_v60 = vpop.f32.mrf.mxu0 }
 0x49b   : > { %v2107_v60 = vld [vmem:[%s2720_s9 + $0x8] sm:$0xff]  }
 0x49c   : > { %v1933_v61 = vpop.f32.mrf.mxu0 }
 0x49d   : > { %v2108_v61 = vld [vmem:[%s2720_s9] sm:$0xff]  }
 0x4d3   : > { %v1097_v5 = vpop.xlane.xlu1 %1096 }
 0x4db   : > { %v1219_v62 = vpop.xlane.xlu0 %1218 }
 0x4e3   : > { %v1338_v63 = vpop.xlane.xlu0 %1337 }
 0x4e7   : > { %v981_v0 = vpop.xlane.xlu0 %980 }
 0x4e8   : > { %2121 = vrcp.f32 %v981_v0 }
 0x4e9   : > { %2123 = vrcp.f32 %v1097_v5 }
 0x4ea   : > { %2125 = vrcp.f32 %v1219_v62  ;;  %v1845_v62 = vld [vmem:[%s2719_s8] ss:$0 sm:$0xff] }
 0x4eb   : > { %2127 = vrcp.f32 %v1338_v63 }
 0x4f5   : > { %v2122_v2 = vpop.eup %2121 }
 0x4f6   : > { %v1031_v3 = vmul.f32 %v2122_v2, %v1025_v58  ;;  %v2124_v6 = vpop.eup %2123 }
 0x4f7   : > { %v2126_v13 = vpop.eup %2125 }
 0x4f8   : > { %v1032_v4 = vpack.c.bf16 %v1031_v3, %v1031_v3  ;;  %v2128_v23 = vpop.eup %2127 }
 0x4fa   : > { %1034 = vst.msk [vmem:[#allocation4] sm:$0xf] %vm1033_vm5, %v1032_v4 }
 0x50f   : > { %v1145_v7 = vpop.f32.mrf.mxu0 }
 0x510   : > { %v1151_v8 = vmul.f32 %v2124_v6, %v1145_v7 }
 0x511   : > { %v1944_v9 = vpop.f32.mrf.mxu0 }
 0x512   : > { %v1857_v10 = vpack.c.bf16 %v1151_v8, %v1151_v8 }
 0x513   : > { %v1148_v11 = vpop.f32.mrf.mxu0 }
 0x514   : > { %1156 = vrot.lane.b32.xlu1 %v1857_v10, %s2340_s20 }
 0x515   : > { %v1945_v12 = vpop.f32.mrf.mxu0 }
 0x517   : > { %v1264_v14 = vpop.f32.mrf.mxu0 }
 0x518   : > { %v1270_v17 = vmul.f32 %v2126_v13, %v1264_v14 }
 0x519   : > { %v1956_v18 = vpop.f32.mrf.mxu0 }
 0x51a   : > { %v1858_v20 = vpack.c.bf16 %v1270_v17, %v1270_v17 }
 0x51b   : > { %v1267_v21 = vpop.f32.mrf.mxu0 }
 0x51c   : > { %1275 = vrot.lane.b32.xlu0 %v1858_v20, %s2341_s22 }
 0x51d   : > { %v1957_v22 = vpop.f32.mrf.mxu0 }
 0x51f   : > { %v1383_v24 = vpop.f32.mrf.mxu0 }
 0x520   : > { %v1389_v25 = vmul.f32 %v2128_v23, %v1383_v24 }
 0x521   : > { %v1968_v26 = vpop.f32.mrf.mxu0 }
 0x522   : > { %v1859_v27 = vpack.c.bf16 %v1389_v25, %v1389_v25 }
 0x523   : > { %v1386_v28 = vpop.f32.mrf.mxu0 }
 0x524   : > { %1394 = vrot.lane.b32.xlu1 %v1859_v27, %s2342_s24 }
 0x525   : > { %v1969_v29 = vpop.f32.mrf.mxu0 }
 0x586   : > { %v1157_v30 = vpop.permute.xlu1 %1156 }
 0x587   : > { %1160 = vst.msk [vmem:[#allocation4] sm:$0xf] %vm1159_vm6, %v1157_v30 }
 0x58e   : > { %v1276_v31 = vpop.permute.xlu0 %1275 }
 0x58f   : > { %1279 = vst.msk [vmem:[#allocation4] sm:$0xf] %vm1278_vm7, %v1276_v31 }
 0x596   : > { %v1395_v32 = vpop.permute.xlu1 %1394 }
 0x597   : > { %1398 = vst.msk [vmem:[#allocation4] sm:$0xf] %vm1397_vm8, %v1395_v32 }
 0x59e   : > { %v1399_v33 = vld [vmem:[#allocation4] sm:$0xf] }
 0x59f   : > { %1975 = vmatmul.mubr.msk.bf16.vlgmr.msra.gmra.mxu1 %vm683_vm0, %v1399_v33 }
 0x5a0   : > { %1994 = vmatprep.mubr.msk.bf16.mxu1 %vm2336_vm1, %v2335_v16 }
 0x65f   : > { %v1460_v35 = vpop.f32.mrf.mxu1 }
 0x660   : > { %v1461_v36 = vadd.f32 %v1839_v34, %v1460_v35 }
 0x661   : > { %v1976_v37 = vpop.f32.mrf.mxu1 }
 0x662   : > { %v1466_v38 = vadd.f32 %v1461_v36, %v2557_v1  ;;  %v2105_v1 = vld [vmem:[%s2720_s9 + $0x18] sm:$0xff]  }
 0x663   : > { %v1463_v39 = vpop.f32.mrf.mxu1  ;;  %1987 = vmatpush3.bf16.msra.mxu1 %v2105_v1 }
 0x664   : > { %v1469_v40 = vsel %vm683_vm0, %v1466_v38, 0.0  ;;  %1988 = vmatprep.subr.bf16.mxu1 %v2335_v16 }
 0x665   : > { %1470 = vadd.xlane.f32.xlu1 %v1469_v40  ;;  %v1977_v41 = vpop.f32.mrf.mxu1 }
 0x667   : > { %1989 = vmatpush3.bf16.msra.mxu1 %v2106_v49 }
 0x668   : > { %1990 = vmatprep.subr.bf16.mxu1 %v2335_v16 }
 0x66b   : > { %1991 = vmatpush3.bf16.msra.mxu1 %v2107_v60 }
 0x66c   : > { %1992 = vmatprep.subr.bf16.mxu1 %v2335_v16  ;;  %v1849_v16 = vld [vmem:[%s2721_s10] ss:$0 sm:$0xff] }
 0x66f   : > { %1993 = vmatpush3.bf16.msra.mxu1 %v2108_v61 }
 0x6ee   : > { %v1471_v42 = vpop.xlane.xlu1 %1470 }
 0x6ef   : > { %v1472_v43 = vmul.f32 0.03125, %v1471_v42 }
 0x6f1   : > { %v1473_v44 = vsub.f32 %v1466_v38, %v1472_v43 }
 0x6f3   : > { %v1474_v45 = vmul.f32 %v1473_v44, %v1473_v44 }
 0x6f5   : > { %v1475_v46 = vsel %vm683_vm0, %v1474_v45, 0.0 }
 0x6f6   : > { %1476 = vadd.xlane.f32.xlu0 %v1475_v46 }
 0x77f   : > { %v1477_v50 = vpop.xlane.xlu0 %1476 }
 0x780   : > { %v1478_v51 = vmul.f32 0.03125, %v1477_v50 }
 0x782   : > { %v1479_v52 = vadd.f32 1e-05, %v1478_v51 }
 0x784   : > { %2129 = vrsqrt.f32 %v1479_v52 }
 0x791   : > { %v2130_v53 = vpop.eup %2129 }
 0x792   : > { %v1481_v55 = vmul.f32 %v2130_v53, %v1473_v44 }
 0x794   : > { %v1488_v57 = vmul.f32 %v1843_v54, %v1481_v55 }
 0x796   : > { %v1495_v58 = vadd.f32 %v1844_v56, %v1488_v57 }
 0x798   : > { %v1496_v59 = vpack.c.bf16 %v1495_v58, %v1495_v58 }
 0x79a   : > { %1983 = vmatmul.mubr.msk.bf16.vlgmr.msra.gmra.mxu0 %vm683_vm0, %v1496_v59 }
 0x85a   : > { %v1557_v63 = vpop.f32.mrf.mxu0 }
 0x85b   : > { %v1558_v0 = vadd.f32 %v1845_v62, %v1557_v63 }
 0x85c   : > { %v1984_v2 = vpop.f32.mrf.mxu0 }
 0x85d   : > { %v1563_v3 = vmax.f32 %v1558_v0, 0.0 }
 0x85e   : > { %v1560_v4 = vpop.f32.mrf.mxu0 }
 0x85f   : > { %v1564_v5 = vpack.c.bf16 %v1563_v3, %v1563_v3 }
 0x860   : > { %v1985_v6 = vpop.f32.mrf.mxu0 }
 0x861   : > { %1995 = vmatmul.mubr.msk.bf16.vlgmr.msra.gmra.mxu1 %vm1604_vm9, %v1564_v5 }
 0x921   : > { %v1642_v7 = vpop.f32.mrf.mxu1 }
 0x922   : > { %v1643_v8 = vadd.f32 %v1849_v16, %v1642_v7 }
 0x923   : > { %v1996_v9 = vpop.f32.mrf.mxu1 }
 0x924   : > { %v1648_v10 = vadd.f32 %v1643_v8, %v1466_v38 }
 0x925   : > { %v1645_v11 = vpop.f32.mrf.mxu1 }
 0x926   : > { %1649 = vst.msk [vmem:[%s673_s21] sm:$0xff] %vm683_vm0, %v1648_v10 }
 0x927   : > { %v1997_v12 = vpop.f32.mrf.mxu1 }
 0x928 PF: > { %s31_s26 = sadd.s32 1, %s2325_s26   ;;  %s2750_s24 = sld [smem:[#allocation19_spill]] }
 0x929   : > { %p28_p3 = scmp.ge.s32.totalorder %s31_s26, 4   ;;  %s2751_s25 = smov %s2753_s19 }
 0x92b   :  { %30 = sbr.rel (!%p28_p3) target bundleno = 9 (0x9), region = 150 }
 0x930   :  { %1675 = vsyncpa [#allocation6], 1 }
 0x931   :  { %1677 = vsyncpa [#allocation6 + $0x1], 1 }
 0x932   :  { %1678 = vsyncpa [#allocation8], 1 }
 0x933   :  { %1679 = vsyncpa [#allocation11], 1 }
 0x934   :  { %1680 = vsyncpa [#allocation14], 1 }

// kernel: _lambda_.3
= control target key start
LH: loop header
LB: loop body
LE: loop exit
PB: predicated region body
PF: predicated region fallthrough
CT: control target
= control target key end

     0   :  { %s2440_s0 = inlined_call_operand.vmem [shape: f32[2,8,32], index: 0, kind: input, shape index: {}, may-alias: {0,1}]   ;;  %s2441_s1 = inlined_call_operand.vmem [shape: f32[2,8,32], index: 1, kind: input, shape index: {}, may-alias: {0,1}]   ;;  %s2442_s2 = inlined_call_operand.vmem [shape: bf16[32,32], index: 2, kind: input, shape index: {}]   ;;  %s2443_s3 = inlined_call_operand.vmem [shape: bf16[32,32], index: 3, kind: input, shape index: {}]   ;;  %s2444_s4 = inlined_call_operand.vmem [shape: bf16[32,32], index: 4, kind: input, shape index: {}]   ;;  %s2445_s5 = inlined_call_operand.vmem [shape: bf16[32,32], index: 5, kind: input, shape index: {}]   ;;  %s2446_s6 = inlined_call_operand.vmem [shape: f32[1,32], index: 6, kind: input, shape index: {}]   ;;  %s2447_s7 = inlined_call_operand.vmem [shape: bf16[32,64], index: 7, kind: input, shape index: {}]   ;;  %s2448_s8 = inlined_call_operand.vmem [shape: f32[1,64], index: 8, kind: input, shape index: {}]   ;;  %s2449_s9 = inlined_call_operand.vmem [shape: bf16[64,32], index: 9, kind: input, shape index: {}]   ;;  %s2450_s10 = inlined_call_operand.vmem [shape: f32[1,32], index: 10, kind: input, shape index: {}]   ;;  %s2451_s11 = inlined_call_operand.vmem [shape: f32[1,32], index: 11, kind: input, shape index: {}]   ;;  %s2452_s12 = inlined_call_operand.vmem [shape: f32[1,32], index: 12, kind: input, shape index: {}]   ;;  %s2453_s13 = inlined_call_operand.vmem [shape: f32[1,32], index: 13, kind: input, shape index: {}]   ;;  %s2454_s14 = inlined_call_operand.vmem [shape: f32[1,32], index: 14, kind: input, shape index: {}]   ;;  %s2455_s15 = inlined_call_operand.vmem [shape: f32[1,32], index: 15, kind: input, shape index: {}]   ;;  %s2456_s16 = inlined_call_operand.vmem [shape: f32[1,32], index: 16, kind: input, shape index: {}]   ;;  %s2457_s17 = inlined_call_operand.hbm [shape: f32[2,8,32], index: 17, kind: output, shape index: {}]  }
   0x1   :  { %2462 = sst [smem:[#allocation11_spill]] %s2440_s0 }
   0x2   :  { %2463 = sst [smem:[#allocation12_spill]] %s2441_s1 }
   0x3   :  { %2464 = sst [smem:[#allocation13_spill]] %s2442_s2 }
   0x4   :  { %2465 = sst [smem:[#allocation14_spill]] %s2443_s3 }
   0x5   :  { %2466 = sst [smem:[#allocation15_spill]] %s2444_s4 }
   0x6   :  { %2467 = sst [smem:[#allocation16_spill]] %s2445_s5 }
   0x7   :  { %2468 = sst [smem:[#allocation17_spill]] %s2446_s6 }
   0x8   :  { %2469 = sst [smem:[#allocation18_spill]] %s2455_s15 }
   0x9   :  { %2470 = sst [smem:[#allocation19_spill]] %s2456_s16 }
   0xa   :  { %2471 = sst [smem:[#allocation20_spill]] %s2457_s17 }
   0xb   :  { %22 = vsyncpa [#allocation6], 0 }
   0xc   :  { %24 = vsyncpa [#allocation6 + $0x1], 0  ;;  %s2162_s24 = smov 0   ;;  %s2164_s25 = smov 0  }
   0xd   :  { %s2166_s26 = smov 0   ;;  %s2168_s27 = smov 0  }
   0xe   :  { %s2170_s28 = smov 0   ;;  %s2172_s29 = smov 0  }
   0xf LB: > { %2472 = sst [smem:[#allocation8_spill]] %s2041_s24  ;;  %s1689_s0 = sadd.s32 4294967295, %s2061_s29   ;;  %s2061_s29 = sphi %s2172_s29, %s30_s29   ;;  %s2057_s28 = sphi %s2170_s28, %s2489_s28   ;;  %s2053_s27 = sphi %s2168_s27, %s2488_s27   ;;  %s2049_s26 = sphi %s2166_s26, %s2492_s26   ;;  %s2045_s25 = sphi %s2164_s25, %s2491_s25   ;;  %s2041_s24 = sphi %s2162_s24, %s2490_s24  }
  0x10   : > { %2473 = sst [smem:[#allocation9_spill]] %s2057_s28  ;;  %s1690_s30 = sadd.s32 4294967294, %s2061_s29  }
  0x11   : > { %s42_s18 = sadd.s32 1, %s2057_s28  ;;  %s420_s19 = sadd.s32 1, %s2049_s26 }
  0x12   : > { %p44_p0 = scmp.ge.s32.totalorder %s42_s18, 2  ;;  %p430_p1 = scmp.ne.s32.totalorder %s2049_s26, %s2045_s25 }
  0x13   : > { %p431_p2 = scmp.eq.s32.totalorder %s1689_s0, 1  ;;  %p436_p3 = scmp.ne.s32.totalorder %s2045_s25, %s2041_s24 }
  0x14   : > { %s2494_s18 = smov (%p44_p0, %s42_s18), 0  ;;  %p437_p5 = scmp.eq.s32.totalorder %s1690_s30, 1 }
  0x15   : > { %2474 = sst [smem:[#allocation10_spill]] %s2494_s18  ;;  %p2202_p4 = por %p431_p2, %p430_p1 }
  0x16   : > { %s415_s20 = ssub.s32 %s2057_s28, %s2494_s18  ;;  %p1693_p6 = scmp.ge.s32.totalorder %s2061_s29, 1 }
  0x17   : > { %p418_p7 = scmp.eq.s32.totalorder %s415_s20, 0  ;;  %p2209_p8 = por %p437_p5, %p436_p3 }
  0x18   : > { %p517_p9 = scmp.lt.s32.totalorder %s2061_s29, 3 }
  0x19   : > { %s2215_s22 = scalar_select %p418_p7, %s2049_s26, %s420_s19  }
  0x1a   : > { %p518_p10 = pnand %p1693_p6, %p517_p9 }
  0x1b   : > { %p575_p11 = scmp.lt.s32.totalorder (!%p518_p10), %s2053_s27, 1  ;;  %s2477_s18 = sld [smem:[#allocation12_spill]] (!%p518_p10) }
  0x1c   : > { %521 = sbr.rel (%p518_p10) target bundleno = 2592 (0xa20), region = 88  ;;  %s2478_s16 = sld [smem:[#allocation11_spill]] (!%p518_p10) }
  0x1d   : > { %s2479_s3 = sld [smem:[#allocation14_spill]] (!%p518_p10)  ;;  %s2066_s19 = smov (!%p518_p10), 104  }
  0x1e   : > { %s2480_s4 = sld [smem:[#allocation15_spill]] (!%p518_p10)  ;;  %s2069_s17 = smov (!%p518_p10), 16  }
  0x1f   : > { %s2481_s2 = sld [smem:[#allocation13_spill]] (!%p518_p10)  ;;  %s2070_s24 = smov (!%p518_p10), 24  }
  0x20   : > { %s2482_s5 = sld [smem:[#allocation16_spill]] (!%p518_p10) }
  0x21   : > { %s576_s23 = scalar_select %p575_p11, %s2053_s27, 1  ;;  %vm595_vm0 = vcmask 261120   ;;  %v2063_v16 = vmov 0.0   ;;  %vm2064_vm1 = vmmov 0   ;;  %v1744_v26 = vld [vmem:[%s2451_s11] ss:$0 sm:$0xff] }
  0x22   : > { %1782 = vmatprep.subr.bf16.mxu0 %v2063_v16  ;;  %1790 = vmatprep.subr.bf16.mxu1 %v2063_v16  ;;  %v1745_v28 = vld [vmem:[%s2452_s12] ss:$0 sm:$0xff]  ;;  %vm685_vm2 = vcmask 257024   ;;  %vm838_vm3 = vcmask 64512   ;;  %vm899_vm4 = vcmask 1043456   ;;  %vm945_vm5 = vcmask 60416  }
  0x23   : > { %s1695_s0 = sshll.u32 %s576_s23, 3  ;;  %v1945_v14 = vld [vmem:[%s2479_s3 + $0x8] sm:$0xff]   ;;  %v1947_v17 = vld [vmem:[%s2479_s3] sm:$0xff]   ;;  %1786 = vmatprep.mubr.msk.bf16.mxu0 %vm2064_vm1, %v2063_v16  ;;  %1794 = vmatprep.mubr.msk.bf16.mxu1 %vm2064_vm1, %v2063_v16  ;;  %s2067_s23 = smov 112   ;;  %vm1071_vm6 = vcmask 126016   ;;  %vm1190_vm7 = vcmask 191616  }
  0x24   : > { %s585_s28 = scalar_lea.vmem %s2477_s18, %s1695_s0  ;;  %s581_s15 = scalar_lea.vmem %s2478_s16, %s1695_s0  ;;  %v1946_v15 = vld [vmem:[%s2480_s4 + $0x8] sm:$0xff]   ;;  %1783 = vmatpush3.bf16.msra.mxu0 %v1945_v14  ;;  %v1948_v18 = vld [vmem:[%s2480_s4] sm:$0xff]   ;;  %vm1309_vm8 = vcmask 257216   ;;  %vm1516_vm9 = vcmask 523264  }
  0x25   : > { %v594_v0 = vld [vmem:[%s585_s28] sm:$0xff]  ;;  %1791 = vmatpush3.bf16.msra.mxu1 %v1946_v15  ;;  %1784 = vmatprep.subr.bf16.mxu0 %v2063_v16  ;;  %v1949_v33 = vld [vmem:[%s2481_s2 + $0x8] sm:$0xff]   ;;  %s2065_s18 = smov 120   ;;  %s2068_s0 = smov 8  }
  0x26   : > { %v2225_v1 = vld [vmem:[%s581_s15] sm:$0xff]  ;;  %v596_v2 = vsel %vm595_vm0, %v594_v0, 0.0  ;;  %1792 = vmatprep.subr.bf16.mxu1 %v2063_v16  ;;  %s2483_s6 = sld [smem:[#allocation17_spill]]  ;;  %s572_s28 = sand.u32 1, %s2045_s25  }
  0x27   : > { %v746_v3 = vsel %vm595_vm0, %v2225_v1, 0.0  ;;  %597 = vadd.xlane.f32.xlu0 %v596_v2  ;;  %v1950_v36 = vld [vmem:[%s2481_s2] sm:$0xff]   ;;  %s2485_s15 = sld [smem:[#allocation19_spill]]  ;;  %s1738_s16 = sshll.u32 %s2053_s27, 7 }
  0x28   : > { %1785 = vmatpush3.bf16.msra.mxu0 %v1947_v17  ;;  %s2486_s4 = sld [smem:[#allocation20_spill]] }
  0x29   : > { %1793 = vmatpush3.bf16.msra.mxu1 %v1948_v18  ;;  %1798 = vmatprep.subr.bf16.mxu0 %v2063_v16 }
  0x2a   : > { %1806 = vmatprep.subr.bf16.mxu1 %v2063_v16 }
  0x2b   : > { %747 = vadd.xlane.f32.xlu0 %v746_v3 }
  0xb0   : > { %v598_v4 = vpop.xlane.xlu0 %597 }
  0xb1   : > { %v600_v5 = vmul.f32 0.03125, %v598_v4 }
  0xb3   : > { %v601_v6 = vsub.f32 %v594_v0, %v600_v5 }
  0xb4   : > { %v748_v7 = vpop.xlane.xlu0 %747 }
  0xb5   : > { %v750_v8 = vmul.f32 0.03125, %v748_v7  ;;  %v602_v9 = vmul.f32 %v601_v6, %v601_v6 }
  0xb7   : > { %v751_v10 = vsub.f32 %v2225_v1, %v750_v8  ;;  %v603_v11 = vsel %vm595_vm0, %v602_v9, 0.0 }
  0xb8   : > { %604 = vadd.xlane.f32.xlu1 %v603_v11 }
  0xb9   : > { %v752_v12 = vmul.f32 %v751_v10, %v751_v10 }
  0xbb   : > { %v753_v13 = vsel %vm595_vm0, %v752_v12, 0.0 }
  0xbc   : > { %754 = vadd.xlane.f32.xlu1 %v753_v13 }
 0x141   : > { %v605_v19 = vpop.xlane.xlu1 %604 }
 0x142   : > { %v606_v20 = vmul.f32 0.03125, %v605_v19 }
 0x144   : > { %v607_v21 = vadd.f32 1e-05, %v606_v20 }
 0x145   : > { %v755_v22 = vpop.xlane.xlu1 %754 }
 0x146   : > { %1961 = vrsqrt.f32 %v607_v21  ;;  %v756_v23 = vmul.f32 0.03125, %v755_v22 }
 0x148   : > { %v757_v24 = vadd.f32 1e-05, %v756_v23 }
 0x14a   : > { %1963 = vrsqrt.f32 %v757_v24 }
 0x153   : > { %v1962_v25 = vpop.eup %1961 }
 0x154   : > { %v609_v27 = vmul.f32 %v1962_v25, %v601_v6 }
 0x156   : > { %v616_v29 = vmul.f32 %v1744_v26, %v609_v27 }
 0x157   : > { %v1964_v30 = vpop.eup %1963 }
 0x158   : > { %v623_v31 = vadd.f32 %v1745_v28, %v616_v29  ;;  %v759_v32 = vmul.f32 %v1964_v30, %v751_v10 }
 0x15a   : > { %v624_v34 = vpack.c.bf16 %v623_v31, %v623_v31  ;;  %v766_v35 = vmul.f32 %v1744_v26, %v759_v32 }
 0x15c   : > { %1787 = vmatmul.mubr.msk.bf16.vlgmr.msra.gmra.mxu0 %vm595_vm0, %v624_v34  ;;  %1795 = vmatmul.mubr.msk.bf16.vlgmr.msra.gmra.mxu1 %vm595_vm0, %v624_v34  ;;  %v773_v37 = vadd.f32 %v1745_v28, %v766_v35 }
 0x15d   : > { %1799 = vmatpush3.bf16.msra.mxu0 %v1949_v33  ;;  %1802 = vmatprep.mubr.msk.bf16.mxu0 %vm2064_vm1, %v2063_v16 }
 0x15e   : > { %1800 = vmatprep.subr.bf16.mxu0 %v2063_v16  ;;  %1808 = vmatprep.mubr.msk.bf16.mxu1 %vm2064_vm1, %v2063_v16  ;;  %v774_v38 = vpack.c.bf16 %v773_v37, %v773_v37 }
 0x161   : > { %1801 = vmatpush3.bf16.msra.mxu0 %v1950_v36 }
 0x162   : > { %1812 = vmatprep.subr.bf16.mxu0 %v2063_v16 }
 0x164   : > { %1803 = vmatmul.mubr.msk.bf16.vlgmr.msra.gmra.mxu0 %vm595_vm0, %v774_v38 }
 0x165   : > { %1814 = vmatprep.mubr.msk.bf16.mxu0 %vm2064_vm1, %v2063_v16 }
 0x21c   : > { %v678_v39 = vpop.f32.mrf.mxu0  ;;  %v737_v40 = vpop.f32.mrf.mxu1 }
 0x21d   : > { %v684_v41 = vpack.c.bf16 %v678_v39, %v678_v39  ;;  %v743_v42 = vpack.c.bf16 %v737_v40, %v737_v40 }
 0x21e   : > { %v1788_v43 = vpop.f32.mrf.mxu0  ;;  %v1796_v44 = vpop.f32.mrf.mxu1 }
 0x21f   : > { %686 = vst.msk [vmem:[#allocation2] sm:$0xf] %vm685_vm2, %v684_v41  ;;  %744 = vst.msk [vmem:[#allocation3] sm:$0xf] %vm685_vm2, %v743_v42 }
 0x220   : > { %v681_v45 = vpop.f32.mrf.mxu0  ;;  %v740_v46 = vpop.f32.mrf.mxu1 }
 0x222   : > { %v1789_v47 = vpop.f32.mrf.mxu0  ;;  %v1797_v48 = vpop.f32.mrf.mxu1 }
 0x224   : > { %v828_v49 = vpop.f32.mrf.mxu0 }
 0x225   : > { %v834_v50 = vmul.f32 0.35355338, %v828_v49 }
 0x226   : > { %v1804_v51 = vpop.f32.mrf.mxu0  ;;  %v836_v52 = vld [vmem:[#allocation2] sm:$0xf]  ;;  %v2278_v53 = vld [vmem:[#allocation3] sm:$0xf] }
 0x227   : > { %v835_v54 = vpack.c.bf16 %v834_v50, %v834_v50  ;;  %v843_v55 = vsel %vm838_vm3, %v836_v52, 0  ;;  %v901_v56 = vsel %vm899_vm4, %v2278_v53, 0  ;;  %v1708_v57 = vcombine.low %v836_v52, %v836_v52 }
 0x228   : > { %v831_v58 = vpop.f32.mrf.mxu0  ;;  %1807 = vmatpush3.bf16.xpose.msra.mxu1 %v843_v55  ;;  %1813 = vmatpush3.bf16.msra.mxu0 %v901_v56  ;;  %v1710_v24 = vcombine.low %v2278_v53, %v2278_v53 }
 0x229   : > { %953 = vrot.lane.b32.xlu0 %v1708_v57, %s2065_s18  ;;  %948 = vrot.lane.b32.xlu1 %v835_v54, %s2065_s18 }
 0x22a   : > { %v1805_v59 = vpop.f32.mrf.mxu0  ;;  %1818 = vmatprep.subr.bf16.mxu1 %v2063_v16  ;;  %1824 = vmatprep.subr.bf16.mxu0 %v2063_v16 }
 0x22d   : > { %1194 = vrot.lane.b32.xlu0 %v1708_v57, %s2066_s19  ;;  %1075 = vrot.lane.b32.xlu1 %v1708_v57, %s2067_s23 }
 0x22f   : > { %1809 = vmatmul.mubr.msk.bf16.vlgmr.msra.gmra.mxu1 %vm838_vm3, %v835_v54 }
 0x230   : > { %1820 = vmatprep.mubr.msk.bf16.mxu1 %vm2064_vm1, %v2063_v16 }
 0x231   : > { %1073 = vrot.lane.b32.xlu1 %v835_v54, %s2067_s23 }
 0x235   : > { %1192 = vrot.lane.b32.xlu1 %v835_v54, %s2066_s19 }
 0x29b   : > { %v949_v60 = vpop.permute.xlu1 %948  ;;  %v954_v61 = vpop.permute.xlu0 %953 }
 0x29c   : > { %v959_v62 = vsel %vm838_vm3, %v954_v61, 0 }
 0x29d   : > { %1819 = vmatpush3.bf16.xpose.msra.mxu1 %v959_v62 }
 0x29e   : > { %1830 = vmatprep.subr.bf16.mxu1 %v2063_v16 }
 0x29f   : > { %v1076_v63 = vpop.permute.xlu1 %1075  ;;  %v1195_v2 = vpop.permute.xlu0 %1194 }
 0x2a0   : > { %v1081_v0 = vsel %vm838_vm3, %v1076_v63, 0  ;;  %v1200_v4 = vsel %vm838_vm3, %v1195_v2, 0 }
 0x2a3   : > { %v1074_v3 = vpop.permute.xlu1 %1073 }
 0x2a4   : > { %1821 = vmatmul.mubr.msk.bf16.vlgmr.msra.gmra.mxu1 %vm838_vm3, %v949_v60 }
 0x2a5   : > { %1831 = vmatpush3.bf16.xpose.msra.mxu1 %v1081_v0  ;;  %1832 = vmatprep.mubr.msk.bf16.mxu1 %vm2064_vm1, %v2063_v16 }
 0x2a6   : > { %1842 = vmatprep.subr.bf16.mxu1 %v2063_v16 }
 0x2a7   : > { %v1193_v5 = vpop.permute.xlu1 %1192 }
 0x2ac   : > { %1833 = vmatmul.mubr.msk.bf16.vlgmr.msra.gmra.mxu1 %vm838_vm3, %v1074_v3 }
 0x2ad   : > { %1843 = vmatpush3.bf16.xpose.msra.mxu1 %v1200_v4  ;;  %1844 = vmatprep.mubr.msk.bf16.mxu1 %vm2064_vm1, %v2063_v16 }
 0x2ae   : > { %1854 = vmatprep.subr.bf16.mxu1 %v2063_v16 }
 0x2b4   : > { %1845 = vmatmul.mubr.msk.bf16.vlgmr.msra.gmra.mxu1 %vm838_vm3, %v1193_v5 }
 0x2b5   : > { %1858 = vmatprep.mubr.msk.bf16.mxu1 %vm2064_vm1, %v2063_v16 }
 0x2ef   : > { %v879_v6 = vpop.f32.mrf.mxu1 }
 0x2f0   : > { %v885_v7 = vsel %vm838_vm3, %v879_v6, -inf }
 0x2f1   : > { %886 = vmax.xlane.f32.xlu0 %v885_v7  ;;  %v1810_v8 = vpop.f32.mrf.mxu1 }
 0x2f3   : > { %v882_v9 = vpop.f32.mrf.mxu1 }
 0x2f5   : > { %v1811_v10 = vpop.f32.mrf.mxu1 }
 0x364   : > { %v995_v11 = vpop.f32.mrf.mxu1 }
 0x365   : > { %v1001_v12 = vsel %vm838_vm3, %v995_v11, -inf }
 0x366   : > { %1002 = vmax.xlane.f32.xlu1 %v1001_v12  ;;  %v1822_v13 = vpop.f32.mrf.mxu1 }
 0x368   : > { %v998_v14 = vpop.f32.mrf.mxu1 }
 0x36a   : > { %v1823_v15 = vpop.f32.mrf.mxu1 }
 0x36b   : > { %v1953_v15 = vld [vmem:[%s2482_s5 + $0x8] sm:$0xff]  }
 0x36c   : > { %v1117_v17 = vpop.f32.mrf.mxu1  ;;  %1855 = vmatpush3.bf16.msra.mxu1 %v1953_v15 }
 0x36d   : > { %v1123_v18 = vsel %vm838_vm3, %v1117_v17, -inf  ;;  %1856 = vmatprep.subr.bf16.mxu1 %v2063_v16 }
 0x36e   : > { %1124 = vmax.xlane.f32.xlu0 %v1123_v18  ;;  %v1834_v19 = vpop.f32.mrf.mxu1 }
 0x36f   : > { %v1954_v19 = vld [vmem:[%s2482_s5] sm:$0xff]   ;;  %s1604_s5 = scalar_lea.hbm %s2486_s4, %s1738_s16 }
 0x370   : > { %v1120_v20 = vpop.f32.mrf.mxu1  ;;  %1857 = vmatpush3.bf16.msra.mxu1 %v1954_v19 }
 0x371   : > { %1870 = vmatprep.subr.bf16.mxu1 %v2063_v16 }
 0x372   : > { %v1835_v21 = vpop.f32.mrf.mxu1 }
 0x374   : > { %v1236_v22 = vpop.f32.mrf.mxu1 }
 0x375   : > { %v1242_v23 = vsel %vm838_vm3, %v1236_v22, -inf }
 0x376   : > { %1243 = vmax.xlane.f32.xlu0 %v1242_v23  ;;  %v1846_v25 = vpop.f32.mrf.mxu1 }
 0x377   : > { %1134 = vrot.lane.b32.xlu1 %v1710_v24, %s2067_s23  ;;  %s2071_s23 = smov [#allocation5]  }
 0x378   : > { %v1239_v26 = vpop.f32.mrf.mxu1 }
 0x37a   : > { %v1847_v27 = vpop.f32.mrf.mxu1  ;;  %v887_v28 = vpop.xlane.xlu0 %886 }
 0x37b   : > { %v888_v29 = vsub.f32 %v879_v6, %v887_v28  ;;  %1253 = vrot.lane.b32.xlu1 %v1710_v24, %s2066_s19 }
 0x37d   : > { %v889_v30 = vmul.f32 1.442695, %v888_v29 }
 0x37f   : > { %1965 = vpow2.f32 %v889_v30 }
 0x38c   : > { %v1966_v31 = vpop.eup %1965  ;;  %1015 = vrot.lane.b32.xlu0 %v1710_v24, %s2065_s18  ;;  %s1694_s18 = sshll.u32 %s572_s28, 3 }
 0x38d   : > { %v895_v32 = vpack.c.bf16 %v1966_v31, %v1966_v31  ;;  %v891_v56 = vsel %vm838_vm3, %v1966_v31, 0.0 }
 0x38f   : > { %1815 = vmatmul.mubr.msk.bf16.vlgmr.msra.gmra.mxu0 %vm838_vm3, %v895_v32 }
 0x390   : > { %1826 = vmatprep.mubr.msk.bf16.mxu0 %vm2064_vm1, %v2063_v16 }
 0x3ef   : > { %v1003_v33 = vpop.xlane.xlu1 %1002 }
 0x3f0   : > { %v1004_v34 = vsub.f32 %v995_v11, %v1003_v33 }
 0x3f2   : > { %v1005_v35 = vmul.f32 1.442695, %v1004_v34  ;;  %v1719_v34 = vld [vmem:[%s2483_s6] ss:$0 sm:$0xff]  ;;  %s1592_s6 = scalar_lea.sflag [#allocation6], %s572_s28 }
 0x3f3   : > { %v1135_v46 = vpop.permute.xlu1 %1134 }
 0x3f4   : > { %1967 = vpow2.f32 %v1005_v35  ;;  %v1140_v48 = vsel %vm899_vm4, %v1135_v46, 0 }
 0x3f7   : > { %v1125_v36 = vpop.xlane.xlu0 %1124  ;;  %v1254_v51 = vpop.permute.xlu1 %1253 }
 0x3f8   : > { %v1126_v37 = vsub.f32 %v1117_v17, %v1125_v36  ;;  %v1259_v53 = vsel %vm899_vm4, %v1254_v51, 0 }
 0x3fa   : > { %v1127_v38 = vmul.f32 1.442695, %v1126_v37 }
 0x3fc   : > { %1969 = vpow2.f32 %v1127_v38 }
 0x3ff   : > { %v1244_v39 = vpop.xlane.xlu0 %1243 }
 0x400   : > { %v1245_v40 = vsub.f32 %v1236_v22, %v1244_v39 }
 0x401   : > { %v1968_v41 = vpop.eup %1967 }
 0x402   : > { %v1246_v42 = vmul.f32 1.442695, %v1245_v40  ;;  %v1007_v43 = vsel %vm838_vm3, %v1968_v41, 0.0  ;;  %v1011_v47 = vpack.c.bf16 %v1968_v41, %v1968_v41 }
 0x403   : > { %1008 = vadd.xlane.f32.xlu1 %v1007_v43  ;;  %v1016_v44 = vpop.permute.xlu0 %1015 }
 0x404   : > { %1971 = vpow2.f32 %v1246_v42  ;;  %v1021_v45 = vsel %vm899_vm4, %v1016_v44, 0 }
 0x405   : > { %1825 = vmatpush3.bf16.msra.mxu0 %v1021_v45 }
 0x406   : > { %1836 = vmatprep.subr.bf16.mxu0 %v2063_v16 }
 0x408   : > { %1827 = vmatmul.mubr.msk.bf16.vlgmr.msra.gmra.mxu0 %vm838_vm3, %v1011_v47  ;;  %v1955_v47 = vld [vmem:[%s2447_s7 + $0x8] sm:$0xff]  }
 0x409   : > { %v1970_v49 = vpop.eup %1969  ;;  %1837 = vmatpush3.bf16.msra.mxu0 %v1140_v48  ;;  %1838 = vmatprep.mubr.msk.bf16.mxu0 %vm2064_vm1, %v2063_v16  ;;  %v1957_v48 = vld [vmem:[%s2449_s9 + $0x18] sm:$0xff]  }
 0x40a   : > { %v1129_v50 = vsel %vm838_vm3, %v1970_v49, 0.0  ;;  %1848 = vmatprep.subr.bf16.mxu0 %v2063_v16  ;;  %v1133_v52 = vpack.c.bf16 %v1970_v49, %v1970_v49  ;;  %v1958_v49 = vld [vmem:[%s2449_s9 + $0x10] sm:$0xff]  }
 0x40b   : > { %1130 = vadd.xlane.f32.xlu0 %v1129_v50 }
 0x410   : > { %1839 = vmatmul.mubr.msk.bf16.vlgmr.msra.gmra.mxu0 %vm838_vm3, %v1133_v52 }
 0x411   : > { %v1972_v54 = vpop.eup %1971  ;;  %1849 = vmatpush3.bf16.msra.mxu0 %v1259_v53  ;;  %1850 = vmatprep.mubr.msk.bf16.mxu0 %vm2064_vm1, %v2063_v16 }
 0x412   : > { %v1248_v55 = vsel %vm838_vm3, %v1972_v54, 0.0  ;;  %1862 = vmatprep.subr.bf16.mxu0 %v2063_v16  ;;  %v1252_v57 = vpack.c.bf16 %v1972_v54, %v1972_v54  ;;  %v1723_v54 = vld [vmem:[%s2453_s13] ss:$0 sm:$0xff] }
 0x413   : > { %1249 = vadd.xlane.f32.xlu0 %v1248_v55 }
 0x417   : > { %892 = vadd.xlane.f32.xlu0 %v891_v56  ;;  %v1724_v56 = vld [vmem:[%s2454_s14] ss:$0 sm:$0xff] }
 0x418   : > { %1851 = vmatmul.mubr.msk.bf16.vlgmr.msra.gmra.mxu0 %vm838_vm3, %v1252_v57 }
 0x419   : > { %1866 = vmatprep.mubr.msk.bf16.mxu0 %vm2064_vm1, %v2063_v16  ;;  %1863 = vmatpush3.bf16.msra.mxu0 %v1955_v47 }
 0x41a   : > { %1864 = vmatprep.subr.bf16.mxu0 %v2063_v16 }
 0x44f   : > { %v937_v58 = vpop.f32.mrf.mxu0 }
 0x451   : > { %v1816_v59 = vpop.f32.mrf.mxu0 }
 0x453   : > { %v940_v60 = vpop.f32.mrf.mxu0 }
 0x454   : > { %v1959_v60 = vld [vmem:[%s2449_s9 + $0x8] sm:$0xff]  }
 0x455   : > { %v1817_v61 = vpop.f32.mrf.mxu0 }
 0x456   : > { %v1960_v61 = vld [vmem:[%s2449_s9] sm:$0xff]  }
 0x48c   : > { %v1009_v5 = vpop.xlane.xlu1 %1008 }
 0x494   : > { %v1131_v62 = vpop.xlane.xlu0 %1130 }
 0x49c   : > { %v1250_v63 = vpop.xlane.xlu0 %1249 }
 0x4a0   : > { %v893_v0 = vpop.xlane.xlu0 %892 }
 0x4a1   : > { %1973 = vrcp.f32 %v893_v0 }
 0x4a2   : > { %1975 = vrcp.f32 %v1009_v5 }
 0x4a3   : > { %1977 = vrcp.f32 %v1131_v62  ;;  %v1725_v62 = vld [vmem:[%s2448_s8] ss:$0 sm:$0xff] }
 0x4a4   : > { %1979 = vrcp.f32 %v1250_v63 }
 0x4ae   : > { %v1974_v2 = vpop.eup %1973 }
 0x4af   : > { %v943_v3 = vmul.f32 %v1974_v2, %v937_v58  ;;  %v1976_v6 = vpop.eup %1975 }
 0x4b0   : > { %v1978_v13 = vpop.eup %1977 }
 0x4b1   : > { %v944_v4 = vpack.c.bf16 %v943_v3, %v943_v3  ;;  %v1980_v23 = vpop.eup %1979 }
 0x4b3   : > { %946 = vst.msk [vmem:[#allocation4] sm:$0xf] %vm945_vm5, %v944_v4 }
 0x4c8   : > { %v1057_v7 = vpop.f32.mrf.mxu0 }
 0x4c9   : > { %v1063_v8 = vmul.f32 %v1976_v6, %v1057_v7 }
 0x4ca   : > { %v1828_v9 = vpop.f32.mrf.mxu0 }
 0x4cb   : > { %v1741_v10 = vpack.c.bf16 %v1063_v8, %v1063_v8 }
 0x4cc   : > { %v1060_v11 = vpop.f32.mrf.mxu0 }
 0x4cd   : > { %1068 = vrot.lane.b32.xlu1 %v1741_v10, %s2068_s0  ;;  %s2484_s0 = sld [smem:[#allocation18_spill]] }
 0x4ce   : > { %v1829_v12 = vpop.f32.mrf.mxu0 }
 0x4d0   : > { %v1176_v14 = vpop.f32.mrf.mxu0 }
 0x4d1   : > { %v1182_v17 = vmul.f32 %v1978_v13, %v1176_v14 }
 0x4d2   : > { %v1840_v18 = vpop.f32.mrf.mxu0 }
 0x4d3   : > { %v1742_v20 = vpack.c.bf16 %v1182_v17, %v1182_v17 }
 0x4d4   : > { %v1179_v21 = vpop.f32.mrf.mxu0 }
 0x4d5   : > { %1187 = vrot.lane.b32.xlu0 %v1742_v20, %s2069_s17  ;;  %s574_s17 = scalar_lea.vmem [#allocation5], %s1694_s18 }
 0x4d6   : > { %v1841_v22 = vpop.f32.mrf.mxu0 }
 0x4d8   : > { %v1295_v24 = vpop.f32.mrf.mxu0 }
 0x4d9   : > { %v1301_v25 = vmul.f32 %v1980_v23, %v1295_v24  ;;  %v1735_v24 = vld [vmem:[%s2484_s0] ss:$0 sm:$0xff]  ;;  %s1989_s0 = sshll.u32 %s2071_s23, 4  ;;  %s1990_s0 = int_to_ptr.vmem [resolvable:$false] %s1989_s0 }
 0x4da   : > { %v1852_v26 = vpop.f32.mrf.mxu0  ;;  %s1991_s27 = scalar_lea.vmem %s1990_s0, 256 }
 0x4db   : > { %v1743_v27 = vpack.c.bf16 %v1301_v25, %v1301_v25  ;;  %v1736_v26 = vld [vmem:[%s2485_s15] ss:$0 sm:$0xff] }
 0x4dc   : > { %v1298_v28 = vpop.f32.mrf.mxu0 }
 0x4dd   : > { %1306 = vrot.lane.b32.xlu1 %v1743_v27, %s2070_s24  ;;  %s1606_s24 = sshll.u32 %s574_s17, 4  ;;  %s1607_s24 = int_to_ptr.vmem [resolvable:$true] %s1606_s24 }
 0x4de   : > { %v1853_v29 = vpop.f32.mrf.mxu0  ;;  %s1985_s19 = scalar_lea.vmem %s1607_s24, 128  ;;  %p1992_p1 = scmp.lt.s32.totalorder %s1607_s24, %s1990_s0 }
 0x4df   : > { %p1986_p12 = scmp.ne.s32.totalorder %s1607_s24, %s1985_s19  ;;  %p1993_p2 = scmp.lt.s32.totalorder %s1991_s27, %s1985_s19 }
 0x4e1   : > { %p1987_p13 = pnand %p1986_p12, %p2202_p4  ;;  %p1994_p3 = por %p1993_p2, %p1992_p1 }
 0x4e3   : > { %p1988_p0 = pneg %p1987_p13 }
 0x4e5   : > { %p1995_p5 = pnand %p1994_p3, %p1988_p0 }
 0x53f   : > { %v1069_v30 = vpop.permute.xlu1 %1068 }
 0x540   : > { %1072 = vst.msk [vmem:[#allocation4] sm:$0xf] %vm1071_vm6, %v1069_v30 }
 0x547   : > { %v1188_v31 = vpop.permute.xlu0 %1187 }
 0x548   : > { %1191 = vst.msk [vmem:[#allocation4] sm:$0xf] %vm1190_vm7, %v1188_v31 }
 0x54f   : > { %v1307_v32 = vpop.permute.xlu1 %1306 }
 0x550   : > { %1310 = vst.msk [vmem:[#allocation4] sm:$0xf] %vm1309_vm8, %v1307_v32 }
 0x557   : > { %v1311_v33 = vld [vmem:[#allocation4] sm:$0xf] }
 0x558   : > { %1859 = vmatmul.mubr.msk.bf16.vlgmr.msra.gmra.mxu1 %vm595_vm0, %v1311_v33 }
 0x559   : > { %1878 = vmatprep.mubr.msk.bf16.mxu1 %vm2064_vm1, %v2063_v16  ;;  %1871 = vmatpush3.bf16.msra.mxu1 %v1957_v48 }
 0x55a   : > { %1872 = vmatprep.subr.bf16.mxu1 %v2063_v16 }
 0x55d   : > { %1873 = vmatpush3.bf16.msra.mxu1 %v1958_v49 }
 0x55e   : > { %1874 = vmatprep.subr.bf16.mxu1 %v2063_v16 }
 0x561   : > { %1875 = vmatpush3.bf16.msra.mxu1 %v1959_v60 }
 0x562   : > { %1876 = vmatprep.subr.bf16.mxu1 %v2063_v16  ;;  %v1729_v16 = vld [vmem:[%s2450_s10] ss:$0 sm:$0xff] }
 0x565   : > { %1877 = vmatpush3.bf16.msra.mxu1 %v1960_v61 }
 0x618   : > { %v1372_v35 = vpop.f32.mrf.mxu1 }
 0x619   : > { %v1373_v36 = vadd.f32 %v1719_v34, %v1372_v35 }
 0x61a   : > { %v1860_v37 = vpop.f32.mrf.mxu1 }
 0x61b   : > { %v1378_v38 = vadd.f32 %v1373_v36, %v2225_v1  ;;  %v1956_v1 = vld [vmem:[%s2447_s7] sm:$0xff]  }
 0x61c   : > { %v1375_v39 = vpop.f32.mrf.mxu1  ;;  %1865 = vmatpush3.bf16.msra.mxu0 %v1956_v1 }
 0x61d   : > { %v1381_v40 = vsel %vm595_vm0, %v1378_v38, 0.0 }
 0x61e   : > { %1382 = vadd.xlane.f32.xlu1 %v1381_v40  ;;  %v1861_v41 = vpop.f32.mrf.mxu1 }
 0x6a7   : > { %v1383_v42 = vpop.xlane.xlu1 %1382 }
 0x6a8   : > { %v1384_v43 = vmul.f32 0.03125, %v1383_v42 }
 0x6aa   : > { %v1385_v44 = vsub.f32 %v1378_v38, %v1384_v43 }
 0x6ac   : > { %v1386_v45 = vmul.f32 %v1385_v44, %v1385_v44 }
 0x6ae   : > { %v1387_v46 = vsel %vm595_vm0, %v1386_v45, 0.0 }
 0x6af   : > { %1388 = vadd.xlane.f32.xlu0 %v1387_v46 }
 0x738   : > { %v1389_v50 = vpop.xlane.xlu0 %1388 }
 0x739   : > { %v1390_v51 = vmul.f32 0.03125, %v1389_v50 }
 0x73b   : > { %v1391_v52 = vadd.f32 1e-05, %v1390_v51 }
 0x73d   : > { %1981 = vrsqrt.f32 %v1391_v52 }
 0x74a   : > { %v1982_v53 = vpop.eup %1981 }
 0x74b   : > { %v1393_v55 = vmul.f32 %v1982_v53, %v1385_v44 }
 0x74d   : > { %v1400_v57 = vmul.f32 %v1723_v54, %v1393_v55 }
 0x74f   : > { %v1407_v58 = vadd.f32 %v1724_v56, %v1400_v57 }
 0x751   : > { %v1408_v59 = vpack.c.bf16 %v1407_v58, %v1407_v58 }
 0x753   : > { %1867 = vmatmul.mubr.msk.bf16.vlgmr.msra.gmra.mxu0 %vm595_vm0, %v1408_v59 }
 0x813   : > { %v1469_v63 = vpop.f32.mrf.mxu0 }
 0x814   : > { %v1470_v0 = vadd.f32 %v1725_v62, %v1469_v63 }
 0x815   : > { %v1868_v2 = vpop.f32.mrf.mxu0 }
 0x816   : > { %v1475_v3 = vmax.f32 %v1470_v0, 0.0 }
 0x817   : > { %v1472_v4 = vpop.f32.mrf.mxu0 }
 0x818   : > { %v1476_v5 = vpack.c.bf16 %v1475_v3, %v1475_v3 }
 0x819   : > { %v1869_v6 = vpop.f32.mrf.mxu0 }
 0x81a   : > { %1879 = vmatmul.mubr.msk.bf16.vlgmr.msra.gmra.mxu1 %vm1516_vm9, %v1476_v5 }
 0x8da   : > { %v1554_v7 = vpop.f32.mrf.mxu1 }
 0x8db   : > { %v1555_v8 = vadd.f32 %v1729_v16, %v1554_v7 }
 0x8dc   : > { %v1880_v9 = vpop.f32.mrf.mxu1 }
 0x8dd   : > { %v1560_v10 = vadd.f32 %v1555_v8, %v1378_v38 }
 0x8de   : > { %v1557_v11 = vpop.f32.mrf.mxu1 }
 0x8df   : > { %v1563_v12 = vsel %vm595_vm0, %v1560_v10, 0.0 }
 0x8e0   : > { %1564 = vadd.xlane.f32.xlu0 %v1563_v12  ;;  %v1881_v13 = vpop.f32.mrf.mxu1 }
 0x969   : > { %v1565_v14 = vpop.xlane.xlu0 %1564 }
 0x96a   : > { %v1566_v15 = vmul.f32 0.03125, %v1565_v14 }
 0x96c   : > { %v1567_v17 = vsub.f32 %v1560_v10, %v1566_v15 }
 0x96e   : > { %v1568_v18 = vmul.f32 %v1567_v17, %v1567_v17 }
 0x970   : > { %v1569_v19 = vsel %vm595_vm0, %v1568_v18, 0.0 }
 0x971   : > { %1570 = vadd.xlane.f32.xlu1 %v1569_v19 }
 0x9fa   : > { %v1571_v20 = vpop.xlane.xlu1 %1570 }
 0x9fb   : > { %v1572_v21 = vmul.f32 0.03125, %v1571_v20 }
 0x9fd   : > { %v1573_v22 = vadd.f32 1e-05, %v1572_v21 }
 0x9ff   : > { %1983 = vrsqrt.f32 %v1573_v22 }
 0xa0c   : > { %v1984_v23 = vpop.eup %1983 }
 0xa0d   : > { %v1575_v25 = vmul.f32 %v1984_v23, %v1567_v17 }
 0xa0f   : > { %v1582_v27 = vmul.f32 %v1735_v24, %v1575_v25 }
 0xa11   : > { %v1589_v28 = vadd.f32 %v1736_v26, %v1582_v27 }
 0xa13   : > { %1590 = vst.msk [vmem:[%s574_s17] sm:$0xff] %vm595_vm0, %v1589_v28 }
 0xa14   : > { %1998 = shalt.err (!%p1995_p5)
}
 0xa15   : > { %s1999_s2 = scalar_lea.hbm %s1604_s5, 128  ;;  %s2003_s18 = scalar_lea.hbm %s2486_s4, 256 }
 0xa16   : > { %p2000_p6 = scmp.ne.s32.totalorder %s1604_s5, %s1999_s2  ;;  %p2004_p10 = scmp.lt.s32.totalorder %s1604_s5, %s2486_s4 }
 0xa17   : > { %p2005_p11 = scmp.lt.s32.totalorder %s2003_s18, %s1999_s2 }
 0xa18   : > { %p2001_p7 = pnand %p2000_p6, %p2202_p4 }
 0xa19   : > { %p2006_p12 = por %p2005_p11, %p2004_p10 }
 0xa1a   : > { %p2002_p9 = pneg %p2001_p7 }
 0xa1c   : > { %p2007_p13 = pnand %p2006_p12, %p2002_p9 }
 0xa1e   : > { %2010 = shalt.err (!%p2007_p13)
}
 0xa1f   : > { %1882 = dma.vmem_to_hbm [thread:$0]  (%p2202_p4), %s1607_s24, 128, %s1604_s5, %s1592_s6  }
 0xa20 PF: > { %s2487_s15 = sld [smem:[#allocation8_spill]]  ;;  %p1888_p0 = scmp.ge.s32.totalorder %s2061_s29, 2 }
 0xa22   : > { %p1885_p1 = pnand %p1888_p0, %p2209_p8 }
 0xa24   : > { %p1886_p2 = pneg %p1885_p1 }
 0xa26   : > { %s1618_s16 = sand.u32 1, %s2487_s15  }
 0xa27   : > { %s1619_s17 = scalar_lea.sflag [#allocation6], %s1618_s16 }
 0xa28   : > { %2036 = dma.done.wait (%p1886_p2), %s1619_s17, 128  }
 0xa29   : > { %2038 = vsyncadd (%p1886_p2), %s1619_s17, 4294967168  ;;  %s30_s29 = sadd.s32 1, %s2061_s29   ;;  %s2488_s27 = sld [smem:[#allocation9_spill]] }
 0xa2a   : > { %p27_p3 = scmp.ge.s32.totalorder %s30_s29, 4   ;;  %s2489_s28 = sld [smem:[#allocation10_spill]] }
 0xa2b   : > { %s2490_s24 = smov %s2045_s25  ;;  %s2491_s25 = smov %s2049_s26 }
 0xa2c   : > { %s2492_s26 = smov %s2215_s22  ;;  %29 = sbr.rel (!%p27_p3) target bundleno = 15 (0xf), region = 130 }
 0xa31   :  { %1624 = vsyncpa [#allocation6], 1 }
 0xa32   :  { %1626 = vsyncpa [#allocation6 + $0x1], 1 }

</bundles_post_ra>
